<compile_context>
chip_gen: v6e
topology: v6e:2x2x1
jax: 0.10.0
libtpu: 0.0.40
codegen_flags: <defaults>
</compile_context>

<pallas_src>
import functools
import math

import jax
import jax.numpy as jnp
from jax import lax
from jax.experimental import pallas as pl
from jax.experimental.pallas import tpu as pltpu

COMPUTE_DTYPE = jnp.bfloat16            # MXU operand dtype (f32 accumulation)
STREAM_DTYPE = jnp.bfloat16             # residual stream between pallas_calls


def _round_up(a, b):
    return -(-a // b) * b


def _pick_vmem_limit():
    # v5e/v6e have 128 MiB physical VMEM -> raise the scoped limit for bigger tiles;
    # v7x has 64 MiB per TensorCore -> stay well below it.
    try:
        kind = jax.devices()[0].device_kind.lower()
    except Exception:
        kind = ""
    if "v5" in kind or "v6" in kind:
        return 100 * 1024 * 1024
    return 48 * 1024 * 1024


_CP = pltpu.CompilerParams(dimension_semantics=("parallel",),
                           vmem_limit_bytes=_pick_vmem_limit())


def _pick_leading_block(n, target=8):
    """Largest divisor of n <= target, preferring >= 2 grid steps (megacore)."""
    divs = [d for d in range(1, n + 1) if n % d == 0 and d <= target]
    best = divs[-1] if divs else n
    if best == n and n > 1:
        proper = [d for d in divs if d < n]
        if proper:
            best = proper[-1]
    return best


def _pick_row_block(m, target=512):
    """Largest multiple-of-8 divisor of m <= target; falls back to m (never pads)."""
    d = min(target, m)
    d -= d % 8
    while d >= 8:
        if m % d == 0:
            return d
        d -= 8
    return m


def _layernorm_f32(xf, gamma, beta, eps=1e-5):
    mu = jnp.mean(xf, axis=-1, keepdims=True)
    var = jnp.mean((xf - mu) ** 2, axis=-1, keepdims=True)
    return (xf - mu) * lax.rsqrt(var + eps) * gamma + beta


# ----------------------------- in-kernel helpers ----------------------------

def _mha_residual(x_ref, ln_g, ln_b, wqkv_ref, bqkv_ref, wo_ref, bo_ref,
                  n_head, scale):
    """x + out_proj(MHA(LayerNorm(x))) as an f32 (Bb*L, C) value."""
    Bb, L, C = x_ref.shape
    M = Bb * L
    Dh = C // n_head

    xln = _layernorm_f32(x_ref[...].astype(jnp.float32).reshape(M, C),
                         ln_g[...], ln_b[...]).astype(COMPUTE_DTYPE)
    # Fused QKV projection: single (M, C) @ (C, 3C) matmul (full MXU column fill).
    qkv = jnp.dot(xln, wqkv_ref[...],
                  preferred_element_type=jnp.float32) + bqkv_ref[...]

    # Per-head attention; out-projection accumulated per head with head-major
    # (H, Dh, C) weights -> no lane-axis concat of head outputs, short live ranges.
    attn = jnp.zeros((M, C), jnp.float32)
    for h in range(n_head):
        q = (qkv[:, h * Dh:(h + 1) * Dh] * scale
             ).reshape(Bb, L, Dh).astype(COMPUTE_DTYPE)
        k = qkv[:, C + h * Dh:C + (h + 1) * Dh
                ].reshape(Bb, L, Dh).astype(COMPUTE_DTYPE)
        v = qkv[:, 2 * C + h * Dh:2 * C + (h + 1) * Dh
                ].reshape(Bb, L, Dh).astype(COMPUTE_DTYPE)
        s = jnp.einsum("bld,bmd->blm", q, k, preferred_element_type=jnp.float32)
        s = s - jnp.max(s, axis=-1, keepdims=True)
        p = jnp.exp(s)
        p = p / jnp.sum(p, axis=-1, keepdims=True)        # exact softmax denominator
        oh = jnp.einsum("blm,bmd->bld", p.astype(COMPUTE_DTYPE), v,
                        preferred_element_type=jnp.float32)
        attn = attn + jnp.dot(oh.reshape(M, Dh).astype(COMPUTE_DTYPE), wo_ref[h],
                              preferred_element_type=jnp.float32)

    # Residual: re-read x_ref (VMEM-resident) instead of keeping an f32 copy live
    # across the whole head loop.
    return x_ref[...].astype(jnp.float32).reshape(M, C) + attn + bo_ref[...]


def _mlp_residual(x1, ln_g, ln_b, wfc_ref, bfc_ref, wpr_ref, bpr_ref):
    """x1 + c_proj(QuickGELU(c_fc(LayerNorm(x1)))) as f32 (M, C)."""
    xln = _layernorm_f32(x1, ln_g[...], ln_b[...]).astype(COMPUTE_DTYPE)
    h = jnp.dot(xln, wfc_ref[...], preferred_element_type=jnp.float32) + bfc_ref[...]
    h = h * (1.0 / (1.0 + jnp.exp(-1.702 * h)))           # QuickGELU, exact divide
    y = jnp.dot(h.astype(COMPUTE_DTYPE), wpr_ref[...],
                preferred_element_type=jnp.float32) + bpr_ref[...]
    return x1 + y


# ------------------------------- Pallas kernels ------------------------------

def _embed_ln_kernel(p_ref, w_ref, pos_ref, g_ref, b_ref, o_ref):
    # [CLS | patches] @ W_ext (CLS handled by an extra "1" indicator feature),
    # + positional embedding, ln_pre.  One full aligned output store.
    Bb, L, K = p_ref.shape
    C = w_ref.shape[1]
    emb = jnp.dot(p_ref[...].reshape(Bb * L, K), w_ref[...],
                  preferred_element_type=jnp.float32).reshape(Bb, L, C)
    x3 = emb + pos_ref[...][None]
    o_ref[...] = _layernorm_f32(x3, g_ref[...], b_ref[...]).astype(o_ref.dtype)


def _block_fused_kernel(x_ref, ln1g, ln1b, wqkv, bqkv, wo, bo,
                        ln2g, ln2b, wfc, bfc, wpr, bpr, o_ref, *, n_head, scale):
    # Full residual block in one kernel: x1 = x + attn(ln1(x)); out = x1 + mlp(ln2(x1)).
    Bb, L, C = x_ref.shape
    x1 = _mha_residual(x_ref, ln1g, ln1b, wqkv, bqkv, wo, bo, n_head, scale)
    out = _mlp_residual(x1, ln2g, ln2b, wfc, bfc, wpr, bpr)
    o_ref[...] = out.reshape(Bb, L, C).astype(o_ref.dtype)


def _attn_kernel(x_ref, ln1g, ln1b, wqkv, bqkv, wo, bo, o_ref, *, n_head, scale):
    Bb, L, C = x_ref.shape
    x1 = _mha_residual(x_ref, ln1g, ln1b, wqkv, bqkv, wo, bo, n_head, scale)
    o_ref[...] = x1.reshape(Bb, L, C).astype(o_ref.dtype)


def _mlp_kernel(x_ref, ln2g, ln2b, wfc, bfc, wpr, bpr, o_ref):
    Bb, L, C = x_ref.shape
    out = _mlp_residual(x_ref[...].astype(jnp.float32).reshape(Bb * L, C),
                        ln2g, ln2b, wfc, bfc, wpr, bpr)
    o_ref[...] = out.reshape(Bb, L, C).astype(o_ref.dtype)


def _adapter_kernel(x_ref, w1_ref, b1_ref, cw_ref, cb_ref, w2_ref, b2_ref,
                    o_ref, pad_ref, accL_ref, *, thw, ksize):
    # Fused adapter: fc1 -> depthwise Conv3d (channels-last, VMEM halo) -> fc2,
    # residual-added into x[:, 1:, :].  Adapter channels are padded to a lane
    # multiple at pack time; the output store is one full aligned block.
    T, Hh, Ww = thw
    KT, KH, KW = ksize
    pt, ph, pw = KT // 2, KH // 2, KW // 2
    _T, L, C = x_ref.shape
    HW = L - 1
    Ca = w1_ref.shape[1]            # padded adapter width (multiple of 128)

    # fc1 over all L tokens (aligned M); the CLS row is simply unused by the conv.
    h = jnp.dot(x_ref[...].astype(COMPUTE_DTYPE).reshape(T * L, C), w1_ref[...],
                preferred_element_type=jnp.float32) + b1_ref[...]
    h = h.reshape(T, L, Ca)[:, 1:, :]

    # Zero-padded halo buffer kept in VMEM (no HBM round-trip for the padded copy).
    pad_ref[...] = jnp.zeros_like(pad_ref)
    pad_ref[pt:pt + T, ph:ph + Hh, pw:pw + Ww, :] = h.reshape(T, Hh, Ww, Ca)

    cw = cw_ref[...]
    acc = jnp.zeros((T, Hh, Ww, Ca), jnp.float32)
    for kt in range(KT):
        for kh in range(KH):
            for kw in range(KW):
                acc = acc + (pad_ref[kt:kt + T, kh:kh + Hh, kw:kw + Ww, :]
                             * cw[kt:kt + 1, kh:kh + 1, kw:kw + 1, :])
    acc = acc + cb_ref[...]

    # Scatter conv result back to all L token rows (zero on the CLS row) in VMEM,
    # run fc2 over the full (T*L, Ca) slab, then do ONE aligned full-block store.
    accL_ref[...] = jnp.zeros_like(accL_ref)
    accL_ref[:, 1:, :] = acc.reshape(T, HW, Ca)
    y = jnp.dot(accL_ref[...].reshape(T * L, Ca).astype(COMPUTE_DTYPE), w2_ref[...],
                preferred_element_type=jnp.float32) + b2_ref[...]
    o_ref[...] = (x_ref[...].astype(jnp.float32)
                  + y.reshape(T, L, C)).astype(o_ref.dtype)


def _ln_proj_kernel(x_ref, g_ref, b_ref, w_ref, o_ref):
    # ln_post -> (dropout is identity at inference) -> x @ proj
    xf = x_ref[...].astype(jnp.float32)
    xln = _layernorm_f32(xf, g_ref[...], b_ref[...]).astype(COMPUTE_DTYPE)
    o_ref[...] = jnp.dot(xln, w_ref[...],
                         preferred_element_type=jnp.float32).astype(o_ref.dtype)


# ------------------------------ Pallas wrappers -----------------------------

def _token_block_call(kernel, x, consts, *, block_bt=8, out_dtype=None):
    """Grid over batch rows of a (BT, L, C) activation; consts are whole-array."""
    BT, L, C = x.shape
    Bblk = _pick_leading_block(BT, block_bt)
    out_dtype = out_dtype or x.dtype
    in_specs = [pl.BlockSpec((Bblk, L, C), lambda i: (i, 0, 0))]
    in_specs += [pl.BlockSpec(c.shape, lambda i, nd=c.ndim: (0,) * nd)
                 for c in consts]
    return pl.pallas_call(
        kernel,
        out_shape=jax.ShapeDtypeStruct((BT, L, C), out_dtype),
        grid=(BT // Bblk,),
        in_specs=in_specs,
        out_specs=pl.BlockSpec((Bblk, L, C), lambda i: (i, 0, 0)),
        compiler_params=_CP,
    )(x, *consts)


def pallas_embed_ln(patches_ext, wext, pos, g2, b2, width):
    BT, L, K = patches_ext.shape
    Bblk = _pick_leading_block(BT, 8)
    c2 = lambda i: (0, 0)
    return pl.pallas_call(
        _embed_ln_kernel,
        out_shape=jax.ShapeDtypeStruct((BT, L, width), STREAM_DTYPE),
        grid=(BT // Bblk,),
        in_specs=[
            pl.BlockSpec((Bblk, L, K), lambda i: (i, 0, 0)),
            pl.BlockSpec((K, width), c2),
            pl.BlockSpec((L, width), c2),
            pl.BlockSpec((1, width), c2), pl.BlockSpec((1, width), c2),
        ],
        out_specs=pl.BlockSpec((Bblk, L, width), lambda i: (i, 0, 0)),
        compiler_params=_CP,
    )(patches_ext, wext, pos, g2, b2)


def pallas_block_fused(x, bp, n_head):
    C = x.shape[-1]
    kernel = functools.partial(_block_fused_kernel, n_head=n_head,
                               scale=1.0 / math.sqrt(C // n_head))
    consts = [bp["ln1_g2"], bp["ln1_b2"], bp["wqkvT"], bp["bqkv2"],
              bp["wo_hm"], bp["bo2"], bp["ln2_g2"], bp["ln2_b2"],
              bp["fcT"], bp["fcb2"], bp["prT"], bp["prb2"]]
    return _token_block_call(kernel, x, consts)


def pallas_attention_block(x, bp, n_head):
    C = x.shape[-1]
    kernel = functools.partial(_attn_kernel, n_head=n_head,
                               scale=1.0 / math.sqrt(C // n_head))
    consts = [bp["ln1_g2"], bp["ln1_b2"], bp["wqkvT"], bp["bqkv2"],
              bp["wo_hm"], bp["bo2"]]
    return _token_block_call(kernel, x, consts)


def pallas_mlp_block(x, bp):
    consts = [bp["ln2_g2"], bp["ln2_b2"], bp["fcT"], bp["fcb2"],
              bp["prT"], bp["prb2"]]
    return _token_block_call(_mlp_kernel, x, consts)


def pallas_adapter(x, num_frames, ap):
    BT, L, C = x.shape
    T = num_frames
    B = BT // T
    HW = L - 1
    Hs = Ws = int(round(math.sqrt(HW)))
    assert Hs * Ws == HW
    Ca = ap["w1T"].shape[1]
    KT, KH, KW = ap["conv_w"].shape[:3]
    x4 = x.reshape(B, T, L, C)
    kernel = functools.partial(_adapter_kernel, thw=(T, Hs, Ws), ksize=(KT, KH, KW))
    c2 = lambda i: (0, 0)
    c4 = lambda i: (0, 0, 0, 0)
    out = pl.pallas_call(
        kernel,
        out_shape=jax.ShapeDtypeStruct((B, T, L, C), x.dtype),
        grid=(B,),
        in_specs=[
            pl.BlockSpec((None, T, L, C), lambda i: (i, 0, 0, 0)),
            pl.BlockSpec((C, Ca), c2), pl.BlockSpec((1, Ca), c2),
            pl.BlockSpec((KT, KH, KW, Ca), c4), pl.BlockSpec((1, Ca), c2),
            pl.BlockSpec((Ca, C), c2), pl.BlockSpec((1, C), c2),
        ],
        out_specs=pl.BlockSpec((None, T, L, C), lambda i: (i, 0, 0, 0)),
        scratch_shapes=[
            pltpu.VMEM((T + KT - 1, Hs + KH - 1, Ws + KW - 1, Ca), jnp.float32),
            pltpu.VMEM((T, L, Ca), jnp.float32),
        ],
        compiler_params=_CP,
    )(x4, ap["w1T"], ap["b1_2"], ap["conv_w"], ap["conv_b2"],
      ap["w2T"], ap["b2_2"])
    return out.reshape(BT, L, C)


def pallas_ln_proj(x2, g2, b2, wT, block_m=512):
    M, C = x2.shape
    N = wT.shape[1]
    bm = _pick_row_block(M, block_m)
    c2 = lambda i: (0, 0)
    return pl.pallas_call(
        _ln_proj_kernel,
        out_shape=jax.ShapeDtypeStruct((M, N), jnp.float32),
        grid=(M // bm,),
        in_specs=[pl.BlockSpec((bm, C), lambda i: (i, 0)),
                  pl.BlockSpec((1, C), c2), pl.BlockSpec((1, C), c2),
                  pl.BlockSpec((C, N), c2)],
        out_specs=pl.BlockSpec((bm, N), lambda i: (i, 0)),
        compiler_params=_CP,
    )(x2, g2, b2, wT)


# ------------------------------- Module forward ------------------------------

def residual_attention_block_forward(x, num_frames, bp, n_head):
    if bp["adapter_pre_attn"] is not None:
        x = pallas_adapter(x, num_frames, bp["adapter_pre_attn"])
    # (layer_index == 7 and SUB_FRAME) branch: SUB_FRAME is False -> skipped.
    if bp["adapter_pre_mlp"] is None:
        # Attention + MLP fused into a single pallas_call (one HBM pass saved).
        return pallas_block_fused(x, bp, n_head)
    x = pallas_attention_block(x, bp, n_head)          # x + attn(ln_1(x))
    x = pallas_adapter(x, num_frames, bp["adapter_pre_mlp"])
    return pallas_mlp_block(x, bp)                     # x + mlp(ln_2(x))


def vision_transformer_forward(x_img, params):
    """VisionTransformer.forward for x_img of shape (B, 3, T, R, R)."""
    P = params["patch_size"]
    width = params["width"]
    n_head = params["n_head"]
    B, _, T, R, _ = x_img.shape
    BT = B * T
    Hs = Ws = R // P
    HW = Hs * Ws
    L = HW + 1
    K = 3 * P * P

    # conv1 (stride == kernel, no bias) as a patch-flatten.  The extended patch
    # tensor has one extra leading token with a single "1" feature so the class
    # embedding falls out of the same Pallas matmul (no in-kernel concat).
    x = jnp.transpose(x_img, (0, 2, 1, 3, 4)).reshape(BT, 3, R, R)
    patches = x.reshape(BT, 3, Hs, P, Ws, P)
    patches = jnp.transpose(patches, (0, 2, 4, 1, 3, 5)).reshape(BT, HW, K)
    pe = jnp.zeros((BT, L, K + 1), COMPUTE_DTYPE)
    pe = pe.at[:, 1:, 1:].set(patches.astype(COMPUTE_DTYPE))
    pe = pe.at[:, 0, 0].set(1.0)

    # Patch embedding + class token + positional embedding + ln_pre in one kernel.
    xt = pallas_embed_ln(pe, params["embed_wT"], params["positional_embedding"],
                         params["ln_pre_g2"], params["ln_pre_b2"], width)

    for bp in params["blocks"]:
        xt = residual_attention_block_forward(xt, T, bp, n_head)
        if T == 7:      # replicate Transformer.forward's num_frames == 7 early return
            break

    xcls = xt.reshape(B, T, L, width)[:, :, 0, :].reshape(BT, width)
    # Dropout(0.5) is identity at inference.
    # TODO(synk): training-mode dropout not implemented.
    y = pallas_ln_proj(xcls, params["ln_post_g2"], params["ln_post_b2"],
                       params["projT"])
    return y.reshape(B, T, params["output_dim"])


# ------------------------------ Parameter init -------------------------------

def init_raw_params(key, *, input_resolution, patch_size, width, layers, heads,
                    output_dim, adapter_width, adapter_layers,
                    adapter_kernel_size):
    L = (input_resolution // patch_size) ** 2 + 1
    scale = width ** (-0.5)
    ks = jax.random.split(key, 8 + layers)

    def lin_w(k, out_f, in_f):
        s = 1.0 / math.sqrt(in_f)
        return jax.random.uniform(k, (out_f, in_f), jnp.float32, -s, s)

    def lin_b(k, out_f, in_f):
        s = 1.0 / math.sqrt(in_f)
        return jax.random.uniform(k, (out_f,), jnp.float32, -s, s)

    def adapter_params(k):
        k1, k2, k3, k4 = jax.random.split(k, 4)
        return {
            "fc1_w": lin_w(k1, adapter_width, width),
            "fc1_b": jnp.zeros((adapter_width,), jnp.float32),   # __init__: 0
            # NOTE: module zero-inits the depthwise conv; small nonzero values
            # are used here so the conv path is actually exercised.
            "conv_w": 0.05 * jax.random.normal(
                k2, (*adapter_kernel_size, adapter_width), jnp.float32),
            "conv_b": 0.01 * jax.random.normal(k3, (adapter_width,), jnp.float32),
            "fc2_w": lin_w(k4, width, adapter_width),
            "fc2_b": jnp.zeros((width,), jnp.float32),            # __init__: 0
        }

    def block_params(k, use_adapter):
        kk = jax.random.split(k, 10)
        return {
            "ln1_g": jnp.ones((width,), jnp.float32),
            "ln1_b": jnp.zeros((width,), jnp.float32),
            "ln2_g": jnp.ones((width,), jnp.float32),
            "ln2_b": jnp.zeros((width,), jnp.float32),
            "attn_in_w": lin_w(kk[0], 3 * width, width),
            "attn_in_b": lin_b(kk[1], 3 * width, width),
            "attn_out_w": lin_w(kk[2], width, width),
            "attn_out_b": lin_b(kk[3], width, width),
            "fc_w": lin_w(kk[4], 4 * width, width),
            "fc_b": lin_b(kk[5], 4 * width, width),
            "proj_w": lin_w(kk[6], width, 4 * width),
            "proj_b": lin_b(kk[7], width, 4 * width),
            "adapter_pre_attn": adapter_params(kk[8]) if use_adapter else None,
            "adapter_pre_mlp": adapter_params(kk[9]) if use_adapter else None,
        }

    blocks = [block_params(ks[8 + i], i >= layers - adapter_layers)
              for i in range(layers)]
    return {
        "conv1_w": scale * jax.random.normal(
            ks[0], (width, 3, patch_size, patch_size), jnp.float32),
        "class_embedding": scale * jax.random.normal(ks[1], (width,), jnp.float32),
        "positional_embedding": scale * jax.random.normal(
            ks[2], (L, width), jnp.float32),
        "ln_pre_g": jnp.ones((width,), jnp.float32),
        "ln_pre_b": jnp.zeros((width,), jnp.float32),
        "ln_post_g": jnp.ones((width,), jnp.float32),
        "ln_post_b": jnp.zeros((width,), jnp.float32),
        "proj": scale * jax.random.normal(ks[3], (width, output_dim), jnp.float32),
        "blocks": blocks,
    }


def _pack_adapter(a):
    if a is None:
        return None
    Ca = a["fc1_w"].shape[0]
    Cap = _round_up(Ca, 128)            # lane-dense adapter channels
    dp = Cap - Ca
    return {
        "w1T": jnp.pad(a["fc1_w"].T, ((0, 0), (0, dp))).astype(COMPUTE_DTYPE),
        "b1_2": jnp.pad(a["fc1_b"], (0, dp)).reshape(1, -1).astype(jnp.float32),
        "conv_w": jnp.pad(a["conv_w"],
                          ((0, 0), (0, 0), (0, 0), (0, dp))).astype(jnp.float32),
        "conv_b2": jnp.pad(a["conv_b"], (0, dp)).reshape(1, -1).astype(jnp.float32),
        "w2T": jnp.pad(a["fc2_w"].T, ((0, dp), (0, 0))).astype(COMPUTE_DTYPE),
        "b2_2": a["fc2_b"].reshape(1, -1).astype(jnp.float32),
    }


def pack_params(raw, *, n_head, patch_size, width, output_dim):
    cd = COMPUTE_DTYPE
    C = width
    H = n_head
    Dh = C // H

    def r2(v):
        return v.reshape(1, -1).astype(jnp.float32)

    blocks = []
    for b in raw["blocks"]:
        in_w, in_b = b["attn_in_w"], b["attn_in_b"]
        blocks.append({
            "ln1_g2": r2(b["ln1_g"]), "ln1_b2": r2(b["ln1_b"]),
            "ln2_g2": r2(b["ln2_g"]), "ln2_b2": r2(b["ln2_b"]),
            # Fused QKV weight, pre-transposed: (C, 3C) with columns [q | k | v].
            "wqkvT": in_w.T.astype(cd),
            "bqkv2": in_b.reshape(1, -1).astype(jnp.float32),
            # Head-major out-projection: (H, Dh, C).
            "wo_hm": b["attn_out_w"].T.reshape(H, Dh, C).astype(cd),
            "bo2": r2(b["attn_out_b"]),
            "fcT": b["fc_w"].T.astype(cd), "fcb2": r2(b["fc_b"]),
            "prT": b["proj_w"].T.astype(cd), "prb2": r2(b["proj_b"]),
            "adapter_pre_attn": _pack_adapter(b["adapter_pre_attn"]),
            "adapter_pre_mlp": _pack_adapter(b["adapter_pre_mlp"]),
        })

    # Extended patch-embedding weight: row 0 is the class embedding (selected by
    # the CLS indicator feature), rows 1.. are the flattened conv1 filters.
    embed_wT = jnp.concatenate(
        [raw["class_embedding"].reshape(1, width),
         raw["conv1_w"].reshape(width, -1).T], axis=0).astype(cd)

    return {
        "patch_size": patch_size, "width": width, "n_head": n_head,
        "output_dim": output_dim,
        "embed_wT": embed_wT,
        "positional_embedding": raw["positional_embedding"].astype(jnp.float32),
        "ln_pre_g2": r2(raw["ln_pre_g"]), "ln_pre_b2": r2(raw["ln_pre_b"]),
        "ln_post_g2": r2(raw["ln_post_g"]), "ln_post_b2": r2(raw["ln_post_b"]),
        "projT": raw["proj"].astype(cd),
        "blocks": blocks,
    }


# ----------------------------- Pure-JAX reference ----------------------------

def _ref_ln(x, g, b, eps=1e-5):
    mu = x.mean(-1, keepdims=True)
    var = ((x - mu) ** 2).mean(-1, keepdims=True)
    return (x - mu) / jnp.sqrt(var + eps) * g + b


def _ref_attention(x, bl, n_head):
    BT, L, C = x.shape
    Dh = C // n_head
    qkv = x @ bl["attn_in_w"].T + bl["attn_in_b"]
    qkv = qkv.reshape(BT, L, 3 * n_head, Dh).transpose(0, 2, 1, 3)
    q, k, v = (qkv[:, :n_head], qkv[:, n_head:2 * n_head], qkv[:, 2 * n_head:])
    s = jnp.einsum("bhld,bhmd->bhlm", q, k) / math.sqrt(Dh)
    a = jax.nn.softmax(s, axis=-1)
    o = jnp.einsum("bhlm,bhmd->bhld", a, v).transpose(0, 2, 1, 3).reshape(BT, L, C)
    return o @ bl["attn_out_w"].T + bl["attn_out_b"]


def _ref_adapter(x, T, ap):
    BT, L, C = x.shape
    B = BT // T
    HW = L - 1
    H = W = int(round(math.sqrt(HW)))
    Ca = ap["fc1_w"].shape[0]
    KT, KH, KW = ap["conv_w"].shape[:3]
    h = x[:, 1:, :] @ ap["fc1_w"].T + ap["fc1_b"]
    h = h.reshape(B, T, H, W, Ca).transpose(0, 4, 1, 2, 3)          # NCDHW
    w = ap["conv_w"].transpose(3, 0, 1, 2)[:, None]                 # (Ca,1,KT,KH,KW)
    hc = lax.conv_general_dilated(
        h, w, window_strides=(1, 1, 1),
        padding=[(KT // 2, KT // 2), (KH // 2, KH // 2), (KW // 2, KW // 2)],
        dimension_numbers=("NCDHW", "OIDHW", "NCDHW"),
        feature_group_count=Ca)
    hc = hc + ap["conv_b"][None, :, None, None, None]
    hc = hc.transpose(0, 2, 3, 4, 1).reshape(BT, HW, Ca)
    y = hc @ ap["fc2_w"].T + ap["fc2_b"]
    return x.at[:, 1:, :].add(y)


def _ref_block(x, T, bl, n_head):
    if bl["adapter_pre_attn"] is not None:
        x = _ref_adapter(x, T, bl["adapter_pre_attn"])
    x = x + _ref_attention(_ref_ln(x, bl["ln1_g"], bl["ln1_b"]), bl, n_head)
    if bl["adapter_pre_mlp"] is not None:
        x = _ref_adapter(x, T, bl["adapter_pre_mlp"])
    xl = _ref_ln(x, bl["ln2_g"], bl["ln2_b"])
    h = xl @ bl["fc_w"].T + bl["fc_b"]
    h = h * jax.nn.sigmoid(1.702 * h)
    return x + h @ bl["proj_w"].T + bl["proj_b"]


def _ref_vit(x_img, raw, n_head, patch_size):
    B, _, T, R, _ = x_img.shape
    width = raw["conv1_w"].shape[0]
    P = patch_size
    Hs = Ws = R // P
    x = jnp.transpose(x_img, (0, 2, 1, 3, 4)).reshape(B * T, 3, R, R)
    patches = x.reshape(B * T, 3, Hs, P, Ws, P).transpose(0, 2, 4, 1, 3, 5)
    patches = patches.reshape(B * T, Hs * Ws, 3 * P * P)
    emb = patches @ raw["conv1_w"].reshape(width, -1).T
    cls = jnp.broadcast_to(raw["class_embedding"].reshape(1, 1, width),
                           (B * T, 1, width))
    xt = jnp.concatenate([cls, emb], axis=1) + raw["positional_embedding"][None]
    xt = _ref_ln(xt, raw["ln_pre_g"], raw["ln_pre_b"])
    for bl in raw["blocks"]:
        xt = _ref_block(xt, T, bl, n_head)
        if T == 7:
            break
    xcls = xt.reshape(B, T, -1, width)[:, :, 0, :]
    xcls = _ref_ln(xcls, raw["ln_post_g"], raw["ln_post_b"])
    return xcls @ raw["proj"]


# ------------------------------------ main -----------------------------------

if __name__ == "__main__":
    input_resolution, patch_size = 16, 4
    width, heads, layers = 32, 4, 2
    output_dim = 16
    adapter_width, adapter_layers = 8, 1    # block 0: fused attn+MLP; block 1: adapters
    adapter_kernel_size = (3, 3, 3)
    B, T = 2, 2                       # BT = 4, L = 17 tokens (CLS + 4x4 patches)

    key = jax.random.PRNGKey(0)
    kx, kp = jax.random.split(key)
    x_img = jax.random.normal(
        kx, (B, 3, T, input_resolution, input_resolution), jnp.float32)

    raw = init_raw_params(
        kp, input_resolution=input_resolution, patch_size=patch_size, width=width,
        layers=layers, heads=heads, output_dim=output_dim,
        adapter_width=adapter_width, adapter_layers=adapter_layers,
        adapter_kernel_size=adapter_kernel_size)
    packed = pack_params(raw, n_head=heads, patch_size=patch_size,
                         width=width, output_dim=output_dim)

    out = vision_transformer_forward(x_img, packed)
    out = jax.block_until_ready(out)
    assert out.shape == (B, T, output_dim)

    ref = _ref_vit(x_img, raw, heads, patch_size)
    scale = float(jnp.max(jnp.abs(ref)))
    err = float(jnp.max(jnp.abs(out - ref)))
    assert err <= 5e-2 * scale + 1e-3, (
        f"mismatch vs reference: max abs err={err}, ref scale={scale}")
    print("KERNEL_OK")
</pallas_src>

<mosaic_0001>
module attributes {stable_mosaic.version = 11 : i64} {
  func.func @_embed_ln_kernel(%arg0: i32, %arg1: memref<2x17x49xbf16, #tpu.memory_space<vmem>>, %arg2: memref<49x32xbf16, #tpu.memory_space<vmem>>, %arg3: memref<17x32xf32, #tpu.memory_space<vmem>>, %arg4: memref<1x32xf32, #tpu.memory_space<vmem>>, %arg5: memref<1x32xf32, #tpu.memory_space<vmem>>, %arg6: memref<2x17x32xbf16, #tpu.memory_space<vmem>>) attributes {dimension_semantics = [#tpu.dimension_semantics<parallel>], iteration_bounds = array<i64: 2>, scalar_prefetch = 0 : i64, scratch_operands = 0 : i64, tpu.core_type = #tpu.core_type<tc>, window_params = [{transform_indices = @transform_0, window_bounds = array<i64: 2, 17, 49>}, {pipeline_mode = #tpu.pipeline_mode<synchronous>, transform_indices = @transform_1, window_bounds = array<i64: 49, 32>}, {pipeline_mode = #tpu.pipeline_mode<synchronous>, transform_indices = @transform_2, window_bounds = array<i64: 17, 32>}, {pipeline_mode = #tpu.pipeline_mode<synchronous>, transform_indices = @transform_3, window_bounds = array<i64: 1, 32>}, {pipeline_mode = #tpu.pipeline_mode<synchronous>, transform_indices = @transform_4, window_bounds = array<i64: 1, 32>}, {transform_indices = @transform_5, window_bounds = array<i64: 2, 17, 32>}]} {
    %c0 = arith.constant 0 : index
    %c0_0 = arith.constant 0 : index
    %c0_1 = arith.constant 0 : index
    %0 = vector.load %arg1[%c0, %c0_0, %c0_1] : memref<2x17x49xbf16, #tpu.memory_space<vmem>>, vector<2x17x49xbf16>
    %1 = vector.shape_cast %0 : vector<2x17x49xbf16> to vector<34x49xbf16>
    %c0_2 = arith.constant 0 : index
    %c0_3 = arith.constant 0 : index
    %2 = vector.load %arg2[%c0_2, %c0_3] : memref<49x32xbf16, #tpu.memory_space<vmem>>, vector<49x32xbf16>
    %cst = arith.constant dense<0.000000e+00> : vector<34x32xf32>
    %3 = tpu.matmul %1, %2, %cst {dimension_numbers = #tpu.dot_dimension_numbers<[1], [0], [0], [1], [0, 0, 1, 1], [], []>} : vector<34x49xbf16>, vector<49x32xbf16>, vector<34x32xf32> -> vector<34x32xf32>
    %4 = vector.shape_cast %3 : vector<34x32xf32> to vector<2x17x32xf32>
    %c0_4 = arith.constant 0 : index
    %c0_5 = arith.constant 0 : index
    %5 = vector.load %arg3[%c0_4, %c0_5] : memref<17x32xf32, #tpu.memory_space<vmem>>, vector<17x32xf32>
    %6 = vector.shape_cast %5 : vector<17x32xf32> to vector<1x17x32xf32>
    %7 = vector.broadcast %6 : vector<1x17x32xf32> to vector<2x17x32xf32>
    %8 = arith.addf %4, %7 : vector<2x17x32xf32>
    %c0_6 = arith.constant 0 : index
    %c0_7 = arith.constant 0 : index
    %9 = vector.load %arg4[%c0_6, %c0_7] : memref<1x32xf32, #tpu.memory_space<vmem>>, vector<1x32xf32>
    %c0_8 = arith.constant 0 : index
    %c0_9 = arith.constant 0 : index
    %10 = vector.load %arg5[%c0_8, %c0_9] : memref<1x32xf32, #tpu.memory_space<vmem>>, vector<1x32xf32>
    %cst_10 = arith.constant dense<0.000000e+00> : vector<2x17xf32>
    %11 = vector.multi_reduction <add>, %8, %cst_10 [2] : vector<2x17x32xf32> to vector<2x17xf32>
    %12 = vector.shape_cast %11 : vector<2x17xf32> to vector<2x17x1xf32>
    %cst_11 = arith.constant 3.200000e+01 : f32
    %13 = vector.broadcast %cst_11 : f32 to vector<2x17x1xf32>
    %14 = arith.divf %12, %13 : vector<2x17x1xf32>
    %15 = vector.broadcast %14 : vector<2x17x1xf32> to vector<2x17x32xf32>
    %16 = arith.subf %8, %15 : vector<2x17x32xf32>
    %17 = arith.mulf %16, %16 : vector<2x17x32xf32>
    %cst_12 = arith.constant dense<0.000000e+00> : vector<2x17xf32>
    %18 = vector.multi_reduction <add>, %17, %cst_12 [2] : vector<2x17x32xf32> to vector<2x17xf32>
    %19 = vector.shape_cast %18 : vector<2x17xf32> to vector<2x17x1xf32>
    %cst_13 = arith.constant 3.200000e+01 : f32
    %20 = vector.broadcast %cst_13 : f32 to vector<2x17x1xf32>
    %21 = arith.divf %19, %20 : vector<2x17x1xf32>
    %22 = vector.broadcast %14 : vector<2x17x1xf32> to vector<2x17x32xf32>
    %23 = arith.subf %8, %22 : vector<2x17x32xf32>
    %cst_14 = arith.constant 9.99999974E-6 : f32
    %24 = vector.broadcast %cst_14 : f32 to vector<2x17x1xf32>
    %25 = arith.addf %21, %24 : vector<2x17x1xf32>
    %26 = math.rsqrt %25 : vector<2x17x1xf32>
    %27 = vector.broadcast %26 : vector<2x17x1xf32> to vector<2x17x32xf32>
    %28 = arith.mulf %23, %27 : vector<2x17x32xf32>
    %29 = vector.shape_cast %9 : vector<1x32xf32> to vector<1x1x32xf32>
    %30 = vector.broadcast %29 : vector<1x1x32xf32> to vector<2x17x32xf32>
    %31 = arith.mulf %28, %30 : vector<2x17x32xf32>
    %32 = vector.shape_cast %10 : vector<1x32xf32> to vector<1x1x32xf32>
    %33 = vector.broadcast %32 : vector<1x1x32xf32> to vector<2x17x32xf32>
    %34 = arith.addf %31, %33 : vector<2x17x32xf32>
    %35 = arith.truncf %34 : vector<2x17x32xf32> to vector<2x17x32xbf16>
    %c0_15 = arith.constant 0 : index
    %c0_16 = arith.constant 0 : index
    %c0_17 = arith.constant 0 : index
    %36 = vector.load %arg6[%c0_15, %c0_16, %c0_17] : memref<2x17x32xbf16, #tpu.memory_space<vmem>>, vector<2x17x32xbf16>
    tpu.vector_store %arg6[%c0_15, %c0_16, %c0_17], %35 {strides = array<i32>} : memref<2x17x32xbf16, #tpu.memory_space<vmem>>, vector<2x17x32xbf16>,
    return
  }
  func.func @transform_0(%arg0: i32) -> (i32, i32, i32) {
    %c0_i32 = arith.constant 0 : i32
    %c0_i32_0 = arith.constant 0 : i32
    %c0_i32_1 = arith.constant 0 : i32
    return %arg0, %c0_i32, %c0_i32_0 : i32, i32, i32
  }
  func.func @transform_1(%arg0: i32) -> (i32, i32) {
    %c0_i32 = arith.constant 0 : i32
    %c0_i32_0 = arith.constant 0 : i32
    %c0_i32_1 = arith.constant 0 : i32
    return %c0_i32, %c0_i32_0 : i32, i32
  }
  func.func @transform_2(%arg0: i32) -> (i32, i32) {
    %c0_i32 = arith.constant 0 : i32
    %c0_i32_0 = arith.constant 0 : i32
    %c0_i32_1 = arith.constant 0 : i32
    return %c0_i32, %c0_i32_0 : i32, i32
  }
  func.func @transform_3(%arg0: i32) -> (i32, i32) {
    %c0_i32 = arith.constant 0 : i32
    %c0_i32_0 = arith.constant 0 : i32
    %c0_i32_1 = arith.constant 0 : i32
    return %c0_i32, %c0_i32_0 : i32, i32
  }
  func.func @transform_4(%arg0: i32) -> (i32, i32) {
    %c0_i32 = arith.constant 0 : i32
    %c0_i32_0 = arith.constant 0 : i32
    %c0_i32_1 = arith.constant 0 : i32
    return %c0_i32, %c0_i32_0 : i32, i32
  }
  func.func @transform_5(%arg0: i32) -> (i32, i32, i32) {
    %c0_i32 = arith.constant 0 : i32
    %c0_i32_0 = arith.constant 0 : i32
    %c0_i32_1 = arith.constant 0 : i32
    return %arg0, %c0_i32, %c0_i32_0 : i32, i32, i32
  }
}

</mosaic_0001>

<bundles_post_ra>
// kernel: tpu_custom_call.1
= control target key start
LH: loop header
LB: loop body
LE: loop exit
PB: predicated region body
PF: predicated region fallthrough
CT: control target
= control target key end

     0   :  { %s2818_s18 = smov 0   ;;  %s3716_s0 = inlined_call_operand.vmem [shape: bf16[4,17,49], index: 0, kind: input, shape index: {}]   ;;  %s3717_s1 = inlined_call_operand.vmem [shape: bf16[49,32], index: 1, kind: input, shape index: {}]   ;;  %s3718_s2 = inlined_call_operand.vmem [shape: f32[17,32], index: 2, kind: input, shape index: {}]   ;;  %s3719_s3 = inlined_call_operand.vmem [shape: f32[1,32], index: 3, kind: input, shape index: {}]   ;;  %s3720_s4 = inlined_call_operand.vmem [shape: f32[1,32], index: 4, kind: input, shape index: {}]   ;;  %s3721_s5 = inlined_call_operand.vmem [shape: bf16[4,17,32], index: 5, kind: output, shape index: {}]  }
   0x1 LB: > { %s2660_s19 = sadd.s32 4294967295, %s2782_s18   ;;  %p2664_p0 = scmp.ge.s32.totalorder %s2782_s18, 1  ;;  %s2782_s18 = sphi %s2818_s18, %s15_s18  }
   0x2   : > { %p189_p1 = scmp.lt.s32.totalorder %s2782_s18, 3 }
   0x4   : > { %p190_p2 = pnand %p2664_p0, %p189_p1 }
   0x6   : > { %193 = sbr.rel (%p190_p2) target bundleno = 652 (0x28c), region = 40 }
   0xb   : > { %v2758_v0 = vld [vmem:[%s3717_s1 + $0x18] ss:$0 sps:$4 sm:$0x11]   ;;  %v2784_v1 = vmov 0.0   ;;  %vm571_vm0 = vcmask 1040384   ;;  %v257_v2 = vlaneseq  ;;  %v2785_v3 = vmov 0  }
   0xc   : > { %2717 = vmatprep.subr.bf16.mxu0 %v2784_v1  ;;  %2737 = vmatprep.subr.bf16.mxu1 %v2784_v1  ;;  %v573_v4 = vsel %vm571_vm0, 65535, %v2785_v3  ;;  %vm2786_vm1 = vmmov 0   ;;  %s2665_s22 = sshll.u32 %s2660_s19, 1  ;;  %v2759_v6 = vld [vmem:[%s3717_s1 + $0x10] sm:$0xff]   ;;  %v2787_v7 = vmov 1966171168  }
   0xd   : > { %v575_v5 = vand.u32 %v2758_v0, %v573_v4  ;;  %2725 = vmatprep.mubr.msk.bf16.mxu0 %vm2786_vm1, %v2784_v1  ;;  %2729 = vmatprep.mubr.msk.bf16.mxu1 %vm2786_vm1, %v2784_v1  ;;  %p220_p3 = scmp.lt.s32.totalorder %s2665_s22, 3  ;;  %v255_v8 = vunpack.c.l.s4 %v2787_v7  ;;  %v2838_v9 = vshrl.u32 %v257_v2, 7  ;;  %v2760_v11 = vld [vmem:[%s3717_s1 + $0x8] sm:$0xff]   ;;  %v2761_v14 = vld [vmem:[%s3717_s1] sm:$0xff]   ;;  %vm561_vm2 = vcmask 400384  }
   0xe   : > { %vm1325_vm3 = vcmask 261120   ;;  %vm1332_vm4 = vcmask 253952   ;;  %vm2592_vm5 = vsmask.f32 256  ;;  %vm2588_vm6 = vcmask 257024  }
   0xf   : > { %2718 = vmatpush3.bf16.msra.mxu0 %v575_v5  ;;  %2741 = vmatpush3.bf16.msra.mxu1 %v575_v5  ;;  %s3776_s22 = smov (!%p220_p3, %s2665_s22), 3  ;;  %v256_v10 = vunpack.c.0.s8 %v255_v8  ;;  %vm3592_vm7 = vmand %vm1332_vm4, %vm2592_vm5 }
  0x10   : > { %2719 = vmatprep.subr.bf16.mxu0 %v2784_v1  ;;  %2738 = vmatprep.subr.bf16.mxu1 %v2784_v1  ;;  %s2745_s27 = smul.u32 12, %s3776_s22 }
  0x11   : > { %v2849_v12 = vsub.s32 %v256_v10, %v2838_v9 }
  0x12   : > { %s2858_s30 = scalar_lea.vmem %s3716_s0, %s2745_s27  ;;  %s3577_s21 = scalar_lea.vmem %s3721_s5, %s2745_s27 }
  0x13   : > { %2720 = vmatpush3.bf16.msra.mxu0 %v2759_v6  ;;  %2742 = vmatpush3.bf16.msra.mxu1 %v2759_v6  ;;  %v2669_v13 = vld.sshfl [vmem:[%s2858_s30] sm:$0x33 pattern:$0x75316420] }
  0x14   : > { %2721 = vmatprep.subr.bf16.mxu0 %v2784_v1  ;;  %2739 = vmatprep.subr.bf16.mxu1 %v2784_v1  ;;  %v2670_v15 = vld.sshfl [vmem:[%s2858_s30 + $0x4] sm:$0x33 pattern:$0x75316420]  ;;  %v253_v16 = vcombine.high %v2669_v13, %v2669_v13  ;;  %v260_v17 = vrot.slane %v2669_v13, %v2849_v12 }
  0x15   : > { %v277_v18 = vcombine.high %v2670_v15, %v2670_v15  ;;  %v284_v19 = vrot.slane %v2670_v15, %v2849_v12  ;;  %v2671_v20 = vld.sshfl [vmem:[%s2858_s30 + $0x8] sm:$0x1 pattern:$0x75316420] }
  0x16   : > { %v267_v21 = vrot.slane %v253_v16, %v2849_v12  ;;  %v2672_v22 = vld.sshfl [vmem:[%s2858_s30 + $0xc] sm:$0x33 pattern:$0x75316420]  ;;  %v307_v25 = vrot.slane %v2671_v20, %v2849_v12 }
  0x17   : > { %2722 = vmatpush3.bf16.msra.mxu0 %v2760_v11  ;;  %2743 = vmatpush3.bf16.msra.mxu1 %v2760_v11  ;;  %v291_v23 = vrot.slane %v277_v18, %v2849_v12  ;;  %v2673_v24 = vld.sshfl [vmem:[%s2858_s30 + $0x10] sm:$0x33 pattern:$0x75316420]  ;;  %v315_v26 = vcombine.high %v2672_v22, %v2672_v22  ;;  %v322_v27 = vrot.slane %v2672_v22, %v2849_v12  ;;  %v890_v22 = vld [vmem:[%s3718_s2] sm:$0xff] }
  0x18   : > { %2723 = vmatprep.subr.bf16.mxu0 %v2784_v1  ;;  %2740 = vmatprep.subr.bf16.mxu1 %v2784_v1  ;;  %v428_v28 = vcombine.low %v260_v17, %v267_v21  ;;  %v2684_v29 = vcombine.high %v260_v17, %v267_v21  ;;  %v339_v30 = vcombine.high %v2673_v24, %v2673_v24  ;;  %v2674_v3 = vld.sshfl [vmem:[%s2858_s30 + $0x14] sm:$0x1 pattern:$0x75316420] }
  0x19   : > { %v430_v31 = vcombine.low %v284_v19, %v291_v23  ;;  %v2685_v32 = vcombine.high %v284_v19, %v291_v23  ;;  %v329_v33 = vrot.slane %v315_v26, %v2849_v12  ;;  %v330_v34 = vcombine.high %v322_v27, %v322_v27  ;;  %v891_v23 = vld [vmem:[%s3718_s2 + $0x8] sm:$0xff] }
  0x1a   : > { %v438_v35 = vrot.slane %v428_v28, %v2849_v12  ;;  %v445_v36 = vrot.slane %v2684_v29, %v2849_v12  ;;  %v346_v37 = vrot.slane %v2673_v24, %v2849_v12  ;;  %v353_v38 = vrot.slane %v339_v30, %v2849_v12 }
  0x1b   : > { %2724 = vmatpush3.bf16.msra.mxu0 %v2761_v14  ;;  %2744 = vmatpush3.bf16.msra.mxu1 %v2761_v14  ;;  %v452_v39 = vrot.slane %v430_v31, %v2849_v12  ;;  %v459_v40 = vrot.slane %v2685_v32, %v2849_v12  ;;  %v331_v41 = vcombine.high %v329_v33, %v329_v33  ;;  %v388_v42 = vunpack.i.h.s16 %v322_v27 }
  0x1c   : > { %v460_v43 = vcombine.low %v438_v35, %v445_v36  ;;  %v354_v44 = vcombine.high %v346_v37, %v346_v37  ;;  %v355_v45 = vcombine.high %v353_v38, %v353_v38  ;;  %v390_v46 = vunpack.i.h.s16 %v329_v33 }
  0x1d   : > { %v461_v47 = vcombine.low %v452_v39, %v459_v40  ;;  %v392_v48 = vunpack.i.h.s16 %v330_v34  ;;  %v394_v49 = vunpack.i.h.s16 %v331_v41  ;;  %v396_v50 = vunpack.i.h.s16 %v346_v37 }
  0x1e   : > { %v468_v51 = vrot.slane %v460_v43, %v2849_v12  ;;  %v398_v52 = vunpack.i.h.s16 %v353_v38  ;;  %v400_v53 = vunpack.i.h.s16 %v354_v44  ;;  %v2675_v54 = vpack.i.b16 %v322_v27, %v307_v25 }
  0x1f   : > { %v475_v55 = vrot.slane %v461_v47, %v2849_v12  ;;  %v2676_v56 = vpack.i.b16 %v329_v33, %v388_v42  ;;  %v2677_v57 = vpack.i.b16 %v330_v34, %v390_v46  ;;  %v2678_v58 = vpack.i.b16 %v331_v41, %v392_v48 }
  0x20   : > { %v2679_v59 = vpack.i.b16 %v346_v37, %v394_v49  ;;  %v2680_v60 = vpack.i.b16 %v353_v38, %v396_v50  ;;  %v2681_v61 = vpack.i.b16 %v354_v44, %v398_v52  ;;  %v2682_v62 = vpack.i.b16 %v355_v45, %v400_v53  ;;  %v2693_v50 = vld.sshfl [vmem:[%s3718_s2 + $0x10] sm:$0x1 pattern:$0x75316420] }
  0x21   : > { %v476_v63 = vcombine.low %v468_v51, %v475_v55  ;;  %v477_v0 = vcombine.low %v2675_v54, %v2676_v56  ;;  %v478_v2 = vcombine.low %v2677_v57, %v2678_v58  ;;  %v369_v11 = vrot.slane %v2674_v3, %v2849_v12 }
  0x22   : > { %v479_v4 = vcombine.low %v2679_v59, %v2680_v60  ;;  %v480_v5 = vcombine.low %v2681_v61, %v2682_v62  ;;  %v402_v13 = vunpack.i.h.s16 %v355_v45  ;;  %v896_v24 = vcombine.high %v890_v22, %v890_v22 }
  0x23   : > { %2726 = vmatmul.mubr.msk.bf16.vlgmr.msra.gmra.mxu0 %vm561_vm2, %v476_v63  ;;  %v487_v6 = vrot.slane %v477_v0, %v2849_v12  ;;  %v494_v7 = vrot.slane %v478_v2, %v2849_v12  ;;  %v945_v25 = vcombine.high %v891_v23, %v891_v23  ;;  %v903_v26 = vrot.slane %v890_v22, %v2849_v12 }
  0x24   : > { %v501_v8 = vrot.slane %v479_v4, %v2849_v12  ;;  %v508_v10 = vrot.slane %v480_v5, %v2849_v12  ;;  %v2683_v18 = vpack.i.b16 %v369_v11, %v402_v13  ;;  %v952_v27 = vrot.slane %v891_v23, %v2849_v12 }
  0x25   : > { %v509_v14 = vcombine.low %v487_v6, %v494_v7  ;;  %v959_v28 = vrot.slane %v945_v25, %v2849_v12  ;;  %v911_v29 = vcombine.high %v903_v26, %v903_v26  ;;  %v2911_v32 = vrot.slane %v903_v26, %v2849_v12 }
  0x26   : > { %v510_v15 = vcombine.low %v501_v8, %v508_v10  ;;  %v532_v20 = vrot.slane %v2683_v18, %v2849_v12  ;;  %v960_v30 = vcombine.high %v952_v27, %v952_v27  ;;  %v2920_v37 = vrot.slane %v952_v27, %v2849_v12 }
  0x27   : > { %v517_v16 = vrot.slane %v509_v14, %v2849_v12  ;;  %v961_v34 = vcombine.high %v959_v28, %v959_v28  ;;  %v2917_v36 = vrot.slane %v911_v29, %v2849_v12  ;;  %v2923_v38 = vrot.slane %v959_v28, %v2849_v12 }
  0x28   : > { %v524_v17 = vrot.slane %v510_v15, %v2849_v12  ;;  %v539_v21 = vrot.slane %v532_v20, %v2849_v12  ;;  %v2926_v39 = vrot.slane %v960_v30, %v2849_v12  ;;  %v2934_v43 = vcombine.high %v2911_v32, %v2911_v32 }
  0x29   : > { %v2943_v49 = vrot.slane %v961_v34, %v2849_v12  ;;  %v2950_v51 = vcombine.high %v2917_v36, %v2917_v36  ;;  %v2954_v53 = vcombine.high %v2920_v37, %v2920_v37  ;;  %v2958_v54 = vcombine.high %v2923_v38, %v2923_v38 }
  0x2a   : > { %v525_v19 = vcombine.low %v517_v16, %v524_v17  ;;  %v2962_v55 = vcombine.high %v2926_v39, %v2926_v39  ;;  %v2968_v63 = vrot.slane %v2693_v50, %v2849_v12 }
  0x2b   : > { %v2977_v5 = vcombine.high %v2943_v49, %v2943_v49 }
  0x2c   : > { %2730 = vmatmul.mubr.msk.bf16.vlgmr.msra.gmra.mxu1 %vm561_vm2, %v525_v19 }
  0x2d   : > { %2733 = vmatprep.mubr.msk.bf16.mxu1 %vm2786_vm1, %v2784_v1  ;;  %v910_v1 = vrot.slane %v896_v24, %v2849_v12 }
  0x2f   : > { %v912_v31 = vcombine.high %v910_v1, %v910_v1  ;;  %v2914_v33 = vrot.slane %v910_v1, %v2849_v12 }
  0x31   : > { %v2930_v42 = vrot.slane %v912_v31, %v2849_v12  ;;  %v2938_v44 = vcombine.high %v2914_v33, %v2914_v33 }
  0x33   : > { %v2972_v0 = vcombine.high %v2930_v42, %v2930_v42 }
  0x34   : > { %2734 = vmatmul.mubr.msk.bf16.gmra.mxu1 %vm561_vm2, %v539_v21 }
  0xe3   : > { %v611_v35 = vpop.f32.mrf.mxu0 }
  0xe4   : > { %v638_v40 = vcombine.high %v611_v35, %v611_v35  ;;  %v645_v41 = vrot.slane %v611_v35, %v2849_v12 }
  0xe5   : > { %v2727_v45 = vpop.f32.mrf.mxu0 }
  0xe6   : > { %v652_v46 = vrot.slane %v638_v40, %v2849_v12  ;;  %v653_v47 = vcombine.high %v645_v41, %v645_v41  ;;  %v661_v48 = vrot.slane %v645_v41, %v2849_v12 }
  0xe7   : > { %v614_v52 = vpop.f32.mrf.mxu0 }
  0xe8   : > { %v654_v56 = vcombine.high %v652_v46, %v652_v46  ;;  %v668_v57 = vrot.slane %v652_v46, %v2849_v12  ;;  %v675_v58 = vrot.slane %v653_v47, %v2849_v12  ;;  %v683_v59 = vcombine.high %v661_v48, %v661_v48 }
  0xe9   : > { %v687_v60 = vcombine.high %v614_v52, %v614_v52  ;;  %v694_v61 = vrot.slane %v614_v52, %v2849_v12  ;;  %v2728_v62 = vpop.f32.mrf.mxu0  ;;  %v2980_v6 = vadd.f32 %v2911_v32, %v661_v48 }
  0xea   : > { %v682_v2 = vrot.slane %v654_v56, %v2849_v12  ;;  %v684_v3 = vcombine.high %v668_v57, %v668_v57  ;;  %v685_v4 = vcombine.high %v675_v58, %v675_v58  ;;  %v2983_v7 = vadd.f32 %v2917_v36, %v675_v58 }
  0xeb   : > { %v701_v8 = vrot.slane %v687_v60, %v2849_v12  ;;  %v702_v10 = vcombine.high %v694_v61, %v694_v61  ;;  %v2987_v13 = vadd.f32 %v2934_v43, %v683_v59  ;;  %v2993_v15 = vadd.f32 %v2914_v33, %v668_v57 }
  0xec   : > { %v686_v11 = vcombine.high %v682_v2, %v682_v2  ;;  %v2990_v14 = vadd.f32 %v2950_v51, %v685_v4  ;;  %v619_v16 = vpop.f32.mrf.mxu1  ;;  %v2996_v17 = vadd.f32 %v2930_v42, %v682_v2  ;;  %v710_v19 = vrot.slane %v694_v61, %v2849_v12 }
  0xed   : > { %v703_v18 = vcombine.high %v701_v8, %v701_v8  ;;  %v717_v20 = vrot.slane %v701_v8, %v2849_v12  ;;  %v3001_v21 = vadd.f32 %v2938_v44, %v684_v3  ;;  %v724_v22 = vrot.slane %v702_v10, %v2849_v12 }
  0xee   : > { %v736_v23 = vcombine.high %v619_v16, %v619_v16  ;;  %v743_v24 = vrot.slane %v619_v16, %v2849_v12  ;;  %v2731_v25 = vpop.f32.mrf.mxu1  ;;  %v1095_v26 = vcombine.low %v2980_v6, %v2983_v7  ;;  %v732_v1 = vcombine.high %v710_v19, %v710_v19 }
  0xef   : > { %v731_v27 = vrot.slane %v703_v18, %v2849_v12  ;;  %v733_v28 = vcombine.high %v717_v20, %v717_v20  ;;  %v734_v29 = vcombine.high %v724_v22, %v724_v22  ;;  %v3009_v30 = vadd.f32 %v2926_v39, %v724_v22 }
  0xf0   : > { %v750_v31 = vrot.slane %v736_v23, %v2849_v12  ;;  %v622_v34 = vpop.f32.mrf.mxu1  ;;  %v3013_v35 = vadd.f32 %v2972_v0, %v686_v11  ;;  %v3016_v41 = vadd.f32 %v2920_v37, %v710_v19  ;;  %v3019_v45 = vadd.f32 %v2923_v38, %v717_v20 }
  0xf1   : > { %v735_v40 = vcombine.high %v731_v27, %v731_v27  ;;  %v3022_v46 = vadd.f32 %v2943_v49, %v731_v27  ;;  %v3025_v47 = vadd.f32 %v2954_v53, %v732_v1  ;;  %v3028_v48 = vadd.f32 %v2962_v55, %v734_v29 }
  0xf2   : > { %v751_v50 = vcombine.high %v743_v24, %v743_v24  ;;  %v752_v52 = vcombine.high %v750_v31, %v750_v31  ;;  %v2732_v56 = vpop.f32.mrf.mxu1  ;;  %v3031_v57 = vadd.f32 %v2958_v54, %v733_v28  ;;  %v759_v58 = vrot.slane %v743_v24, %v2849_v12 }
  0xf3   : > { %v766_v59 = vrot.slane %v750_v31, %v2849_v12  ;;  %v785_v60 = vcombine.high %v622_v34, %v622_v34  ;;  %v1144_v61 = vcombine.low %v3016_v41, %v3009_v30  ;;  %v792_v3 = vrot.slane %v622_v34, %v2849_v12 }
  0xf4   : > { %v773_v62 = vrot.slane %v751_v50, %v2849_v12  ;;  %v780_v2 = vrot.slane %v752_v52, %v2849_v12  ;;  %v627_v4 = vpop.f32.mrf.mxu1  ;;  %v1145_v8 = vcombine.low %v3025_v47, %v3028_v48  ;;  %v1146_v10 = vcombine.low %v3019_v45, %v3022_v46 }
  0xf5   : > { %v781_v11 = vcombine.high %v759_v58, %v759_v58  ;;  %v782_v16 = vcombine.high %v766_v59, %v766_v59  ;;  %v3045_v20 = vadd.f32 %v2968_v63, %v759_v58  ;;  %v3048_v22 = vadd.f32 %v2950_v51, %v766_v59 }
  0xf6   : > { %v783_v18 = vcombine.high %v773_v62, %v773_v62  ;;  %v784_v19 = vcombine.high %v780_v2, %v780_v2  ;;  %v2735_v23 = vpop.f32.mrf.mxu1  ;;  %v3051_v24 = vadd.f32 %v2911_v32, %v773_v62  ;;  %v3054_v25 = vadd.f32 %v2914_v33, %v780_v2 }
  0xf7   : > { %v799_v27 = vrot.slane %v785_v60, %v2849_v12  ;;  %v800_v1 = vcombine.high %v792_v3, %v792_v3  ;;  %v3058_v28 = vadd.f32 %v2917_v36, %v781_v11  ;;  %v3061_v29 = vadd.f32 %v2930_v42, %v782_v16 }
  0xf8   : > { %v808_v31 = vrot.slane %v792_v3, %v2849_v12  ;;  %v840_v51 = vrot.slane %v627_v4, %v2849_v12  ;;  %v630_v34 = vpop.f32.mrf.mxu1  ;;  %v3068_v52 = vadd.f32 %v2938_v44, %v784_v19  ;;  %v3071_v56 = vadd.f32 %v2934_v43, %v783_v18 }
  0xf9   : > { %v801_v50 = vcombine.high %v799_v27, %v799_v27  ;;  %v815_v32 = vrot.slane %v799_v27, %v2849_v12  ;;  %v822_v33 = vrot.slane %v800_v1, %v2849_v12  ;;  %v1097_v19 = vcombine.low %v2993_v15, %v2996_v17 }
  0xfa   : > { %v830_v36 = vcombine.high %v808_v31, %v808_v31  ;;  %v3074_v42 = vadd.f32 %v2972_v0, %v808_v31  ;;  %v848_v58 = vrot.slane %v840_v51, %v2849_v12  ;;  %v2736_v59 = vpop.f32.mrf.mxu1  ;;  %v841_v4 = vcombine.high %v840_v51, %v840_v51 }
  0xfb   : > { %v829_v60 = vrot.slane %v801_v50, %v2849_v12  ;;  %v831_v62 = vcombine.high %v815_v32, %v815_v32  ;;  %v832_v2 = vcombine.high %v822_v33, %v822_v33  ;;  %v3079_v3 = vadd.f32 %v2920_v37, %v822_v33 }
  0xfc   : > { %v3082_v44 = vadd.f32 %v2926_v39, %v830_v36  ;;  %v3085_v43 = vadd.f32 %v2962_v55, %v815_v32  ;;  %v3088_v0 = vadd.f32 %v2977_v5, %v735_v40  ;;  %v1210_v37 = vcombine.low %v3068_v52, %v3074_v42 }
  0xfd   : > { %v833_v11 = vcombine.high %v829_v60, %v829_v60  ;;  %v3091_v16 = vadd.f32 %v2954_v53, %v832_v2  ;;  %v3094_v18 = vadd.f32 %v2923_v38, %v829_v60  ;;  %v3099_v39 = vadd.f32 %v2943_v49, %v831_v62 }
  0xfe   : > { %v1256_v55 = vcombine.low %v3079_v3, %v3082_v44  ;;  %v1096_v40 = vcombine.low %v2987_v13, %v2990_v14  ;;  %v3113_v23 = vadd.f32 %v2977_v5, %v848_v58  ;;  %v1098_v49 = vcombine.low %v3001_v21, %v3013_v35 }
  0xff   : > { %v1257_v38 = vcombine.low %v3091_v16, %v3085_v43  ;;  %v3110_v53 = vadd.f32 %v2958_v54, %v833_v11  ;;  %v1105_v27 = vrot.slane %v1095_v26, %v2849_v12  ;;  %v1119_v31 = vrot.slane %v1097_v19, %v2849_v12 }
 0x100   : > { %v1112_v1 = vrot.slane %v1096_v40, %v2849_v12  ;;  %v1147_v51 = vcombine.low %v3031_v57, %v3088_v0  ;;  %v1126_v54 = vrot.slane %v1098_v49, %v2849_v12  ;;  %v1154_v5 = vrot.slane %v1144_v61, %v2849_v12 }
 0x101   : > { %v1161_v34 = vrot.slane %v1145_v8, %v2849_v12  ;;  %v1168_v50 = vrot.slane %v1146_v10, %v2849_v12  ;;  %v1207_v26 = vcombine.low %v3051_v24, %v3058_v28  ;;  %v1208_v36 = vcombine.low %v3071_v56, %v3048_v22 }
 0x102   : > { %v1127_v32 = vcombine.low %v1105_v27, %v1112_v1  ;;  %v1175_v33 = vrot.slane %v1147_v51, %v2849_v12  ;;  %v1128_v58 = vcombine.low %v1119_v31, %v1126_v54  ;;  %v1209_v60 = vcombine.low %v3054_v25, %v3061_v29 }
 0x103   : > { %v1176_v59 = vcombine.low %v1154_v5, %v1161_v34  ;;  %v1238_v61 = vrot.slane %v1210_v37, %v2849_v12  ;;  %v1259_v8 = vcombine.low %v3110_v53, %v3113_v23  ;;  %v1217_v62 = vrot.slane %v1207_v26, %v2849_v12 }
 0x104   : > { %v1177_v10 = vcombine.low %v1168_v50, %v1175_v33  ;;  %v1224_v2 = vrot.slane %v1208_v36, %v2849_v12  ;;  %v855_v11 = vrot.slane %v841_v4, %v2849_v12  ;;  %v1135_v40 = vrot.slane %v1127_v32, %v2849_v12 }
 0x105   : > { %v1142_v19 = vrot.slane %v1128_v58, %v2849_v12  ;;  %v1231_v49 = vrot.slane %v1209_v60, %v2849_v12  ;;  %v1184_v27 = vrot.slane %v1176_v59, %v2849_v12  ;;  %v1258_v31 = vcombine.low %v3094_v18, %v3099_v39 }
 0x106   : > { %v1191_v37 = vrot.slane %v1177_v10, %v2849_v12  ;;  %v1239_v1 = vcombine.low %v1217_v62, %v1224_v2  ;;  %v1266_v5 = vrot.slane %v1256_v55, %v2849_v12  ;;  %v1273_v4 = vrot.slane %v1257_v38, %v2849_v12 }
 0x107   : > { %v1143_v51 = vcombine.low %v1135_v40, %v1142_v19  ;;  %v1240_v54 = vcombine.low %v1231_v49, %v1238_v61  ;;  %v1199_v50 = vrot.slane %v3045_v20, %v2849_v12  ;;  %v1280_v32 = vrot.slane %v1258_v31, %v2849_v12 }
 0x108   : > { %v1192_v34 = vcombine.low %v1184_v27, %v1191_v37  ;;  %v1287_v33 = vrot.slane %v1259_v8, %v2849_v12  ;;  %v1247_v36 = vrot.slane %v1239_v1, %v2849_v12  ;;  %v1288_v59 = vcombine.low %v1266_v5, %v1273_v4 }
 0x109   : > { %v1326_v26 = vsel %vm1325_vm3, %v1143_v51, 0.0  ;;  %v1254_v58 = vrot.slane %v1240_v54, %v2849_v12  ;;  %v3159_v55 = vadd.f32 %v2968_v63, %v855_v11  ;;  %v1206_v2 = vrot.slane %v1199_v50, %v2849_v12 }
 0x10a   : > { %1327 = vadd.xlane.f32.xlu0 %v1326_v26  ;;  %v1289_v60 = vcombine.low %v1280_v32, %v1287_v33  ;;  %v1329_v38 = vsel %vm1325_vm3, %v1192_v34, 0.0  ;;  %v1296_v10 = vrot.slane %v1288_v59, %v2849_v12  ;;  %v3173_v37 = vsub.s32 0, %v2838_v9 }
 0x10b   : > { %v1255_v61 = vcombine.low %v1247_v36, %v1254_v58  ;;  %v1311_v40 = vrot.slane %v3159_v55, %v2849_v12  ;;  %v1333_v11 = vsel %vm1332_vm4, %v1206_v2, 0.0  ;;  %v3176_v1 = vsub.s32 1, %v2838_v9 }
 0x10c   : > { %v1303_v62 = vrot.slane %v1289_v60, %v2849_v12  ;;  %v3179_v31 = vsub.s32 2, %v2838_v9  ;;  %v3182_v51 = vsub.s32 3, %v2838_v9  ;;  %v3185_v5 = vsub.s32 4, %v2838_v9 }
 0x10d   : > { %v1336_v8 = vsel %vm1325_vm3, %v1255_v61, 0.0  ;;  %v1318_v49 = vrot.slane %v1311_v40, %v2849_v12  ;;  %v3188_v4 = vsub.s32 5, %v2838_v9  ;;  %v3191_v34 = vsub.s32 6, %v2838_v9 }
 0x10e   : > { %1330 = vadd.xlane.f32.xlu0 %v1329_v38  ;;  %1337 = vadd.xlane.f32.xlu1 %v1336_v8  ;;  %v1304_v19 = vcombine.low %v1296_v10, %v1303_v62  ;;  %v3194_v50 = vsub.s32 7, %v2838_v9 }
 0x10f   : > { %v1342_v27 = vsel %vm1332_vm4, %v1318_v49, 0.0 }
 0x110   : > { %v1339_v63 = vsel %vm1325_vm3, %v1304_v19, 0.0 }
 0x112   : > { %1334 = vadd.xlane.f32.xlu0 %v1333_v11  ;;  %1340 = vadd.xlane.f32.xlu1 %v1339_v63 }
 0x116   : > { %1343 = vadd.xlane.f32.xlu1 %v1342_v27 }
 0x193   : > { %v1328_v54 = vpop.xlane.xlu0 %1327 }
 0x194   : > { %v1346_v32 = vmul.f32 0.03125, %v1328_v54 }
 0x196   : > { %v1361_v33 = vrot.slane %v1346_v32, %v3173_v37  ;;  %v1365_v26 = vrot.slane %v1346_v32, %v3176_v1  ;;  %v1369_v36 = vrot.slane %v1346_v32, %v3179_v31  ;;  %v1373_v58 = vrot.slane %v1346_v32, %v3182_v51 }
 0x197   : > { %v1331_v59 = vpop.xlane.xlu0 %1330  ;;  %v1338_v60 = vpop.xlane.xlu1 %1337  ;;  %v1377_v38 = vrot.slane %v1346_v32, %v3185_v5  ;;  %v1381_v61 = vrot.slane %v1346_v32, %v3188_v4  ;;  %v1385_v10 = vrot.slane %v1346_v32, %v3191_v34  ;;  %v1389_v9 = vrot.slane %v1346_v32, %v3194_v50 }
 0x198   : > { %v1349_v62 = vmul.f32 0.03125, %v1338_v60  ;;  %v3205_v8 = vsub.f32 %v2980_v6, %v1361_v33  ;;  %v3208_v2 = vsub.f32 %v2983_v7, %v1365_v26  ;;  %v3211_v40 = vsub.f32 %v2987_v13, %v1369_v36 }
 0x199   : > { %v3214_v19 = vsub.f32 %v2990_v14, %v1373_v58  ;;  %v3217_v63 = vsub.f32 %v2993_v15, %v1377_v38  ;;  %v3220_v11 = vsub.f32 %v2996_v17, %v1381_v61  ;;  %v3223_v49 = vsub.f32 %v3001_v21, %v1385_v10 }
 0x19a   : > { %v3226_v6 = vsub.f32 %v3013_v35, %v1389_v9  ;;  %v1562_v7 = vmul.f32 %v3205_v8, %v3205_v8  ;;  %v1563_v13 = vmul.f32 %v3208_v2, %v3208_v2  ;;  %v1564_v15 = vmul.f32 %v3211_v40, %v3211_v40 }
 0x19b   : > { %3739 = vst [vmem:[#allocation2_spill] sm:$0xff] %v3217_v63  ;;  %3740 = vst [vmem:[#allocation3_spill] sm:$0xff] %v3220_v11  ;;  %v1335_v14 = vpop.xlane.xlu0 %1334  ;;  %v1341_v27 = vpop.xlane.xlu1 %1340  ;;  %v1565_v17 = vmul.f32 %v3214_v19, %v3214_v19  ;;  %v1566_v21 = vmul.f32 %v3217_v63, %v3217_v63  ;;  %v1567_v35 = vmul.f32 %v3220_v11, %v3220_v11  ;;  %v3240_v54 = vmul.f32 0.03125, %v1331_v59 }
 0x19c   : > { %3741 = vst [vmem:[#allocation4_spill] sm:$0xff] %v3223_v49  ;;  %v1348_v32 = vmul.f32 0.03125, %v1335_v14  ;;  %v1568_v33 = vmul.f32 %v3223_v49, %v3223_v49  ;;  %v1569_v26 = vmul.f32 %v3226_v6, %v3226_v6  ;;  %v1630_v36 = vcombine.low %v1562_v7, %v1563_v13 }
 0x19d   : > { %v1631_v58 = vcombine.low %v1564_v15, %v1565_v17  ;;  %v1632_v60 = vcombine.low %v1566_v21, %v1567_v35  ;;  %v1429_v38 = vrot.slane %v1349_v62, %v3173_v37  ;;  %v1433_v9 = vrot.slane %v1349_v62, %v3176_v1 }
 0x19e   : > { %v1425_v61 = vrot.slane %v1348_v32, %v3173_v37  ;;  %v1633_v10 = vcombine.low %v1568_v33, %v1569_v26  ;;  %v1437_v59 = vrot.slane %v1349_v62, %v3179_v31  ;;  %v1640_v14 = vrot.slane %v1630_v36, %v2849_v12 }
 0x19f   : > { %v1344_v11 = vpop.xlane.xlu1 %1343  ;;  %v1647_v49 = vrot.slane %v1631_v58, %v2849_v12  ;;  %v1654_v63 = vrot.slane %v1632_v60, %v2849_v12  ;;  %v1441_v7 = vrot.slane %v1349_v62, %v3182_v51  ;;  %v1445_v21 = vrot.slane %v1349_v62, %v3185_v5 }
 0x1a0   : > { %v3255_v13 = vsub.f32 %v3045_v20, %v1425_v61  ;;  %v1351_v15 = vmul.f32 0.03125, %v1344_v11  ;;  %v1661_v17 = vrot.slane %v1633_v10, %v2849_v12  ;;  %v1449_v32 = vrot.slane %v1349_v62, %v3188_v4 }
 0x1a1   : > { %v1662_v35 = vcombine.low %v1640_v14, %v1647_v49  ;;  %v1453_v33 = vrot.slane %v1349_v62, %v3191_v34  ;;  %v1457_v26 = vrot.slane %v1349_v62, %v3194_v50  ;;  %v3266_v20 = vsub.f32 %v3051_v24, %v1429_v38 }
 0x1a2   : > { %v1493_v36 = vrot.slane %v1351_v15, %v3173_v37  ;;  %v1663_v58 = vcombine.low %v1654_v63, %v1661_v17  ;;  %v1578_v60 = vmul.f32 %v3255_v13, %v3255_v13  ;;  %v3270_v61 = vsub.f32 %v3058_v28, %v1433_v9 }
 0x1a3   : > { %v1670_v11 = vrot.slane %v1662_v35, %v2849_v12  ;;  %v3273_v49 = vsub.f32 %v3071_v56, %v1437_v59  ;;  %v3276_v10 = vsub.f32 %v3048_v22, %v1441_v7  ;;  %v3284_v24 = vsub.f32 %v3054_v25, %v1445_v21 }
 0x1a4   : > { %v3279_v62 = vsub.f32 %v3159_v55, %v1493_v36  ;;  %v1677_v63 = vrot.slane %v1663_v58, %v2849_v12  ;;  %v1734_v14 = vrot.slane %v1578_v60, %v2849_v12  ;;  %v3287_v38 = vsub.f32 %v3061_v29, %v1449_v32 }
 0x1a5   : > { %v3290_v28 = vsub.f32 %v3068_v52, %v1453_v33  ;;  %v3293_v56 = vsub.f32 %v3074_v42, %v1457_v26  ;;  %v1579_v22 = vmul.f32 %v3266_v20, %v3266_v20  ;;  %v1580_v59 = vmul.f32 %v3270_v61, %v3270_v61 }
 0x1a6   : > { %v1678_v55 = vcombine.low %v1670_v11, %v1677_v63  ;;  %v1741_v9 = vrot.slane %v1734_v14, %v2849_v12  ;;  %v1581_v25 = vmul.f32 %v3273_v49, %v3273_v49  ;;  %v1582_v29 = vmul.f32 %v3276_v10, %v3276_v10 }
 0x1a7   : > { %v1583_v52 = vmul.f32 %v3284_v24, %v3284_v24  ;;  %v1584_v42 = vmul.f32 %v3287_v38, %v3287_v38  ;;  %v1585_v7 = vmul.f32 %v3290_v28, %v3290_v28  ;;  %v1586_v21 = vmul.f32 %v3293_v56, %v3293_v56 }
 0x1a8   : > { %v1860_v15 = vsel %vm1325_vm3, %v1678_v55, 0.0  ;;  %v1866_v17 = vsel %vm1332_vm4, %v1741_v9, 0.0  ;;  %v1742_v35 = vcombine.low %v1579_v22, %v1580_v59  ;;  %v3314_v32 = vmul.f32 0.03125, %v1341_v27 }
 0x1a9   : > { %1861 = vadd.xlane.f32.xlu1 %v1860_v15  ;;  %1867 = vadd.xlane.f32.xlu0 %v1866_v17  ;;  %v1743_v33 = vcombine.low %v1581_v25, %v1582_v29  ;;  %v1744_v26 = vcombine.low %v1583_v52, %v1584_v42  ;;  %v1393_v36 = vrot.slane %v3240_v54, %v3173_v37 }
 0x1aa   : > { %v1745_v58 = vcombine.low %v1585_v7, %v1586_v21  ;;  %v1752_v60 = vrot.slane %v1742_v35, %v2849_v12  ;;  %v1397_v11 = vrot.slane %v3240_v54, %v3176_v1  ;;  %v1401_v63 = vrot.slane %v3240_v54, %v3179_v31 }
 0x1ab   : > { %v1759_v14 = vrot.slane %v1743_v33, %v2849_v12  ;;  %v1766_v27 = vrot.slane %v1744_v26, %v2849_v12  ;;  %v1405_v22 = vrot.slane %v3240_v54, %v3182_v51  ;;  %v1409_v55 = vrot.slane %v3240_v54, %v3185_v5 }
 0x1ac   : > { %v1773_v9 = vrot.slane %v1745_v58, %v2849_v12  ;;  %v1413_v59 = vrot.slane %v3240_v54, %v3188_v4  ;;  %v1417_v25 = vrot.slane %v3240_v54, %v3191_v34  ;;  %v1421_v29 = vrot.slane %v3240_v54, %v3194_v50 }
 0x1ad   : > { %v1774_v52 = vcombine.low %v1752_v60, %v1759_v14  ;;  %v3337_v42 = vsub.f32 %v3016_v41, %v1393_v36  ;;  %v3340_v7 = vsub.f32 %v3009_v30, %v1397_v11  ;;  %v3343_v15 = vsub.f32 %v3025_v47, %v1401_v63 }
 0x1ae   : > { %v1775_v17 = vcombine.low %v1766_v27, %v1773_v9  ;;  %v3346_v21 = vsub.f32 %v3028_v48, %v1405_v22  ;;  %v3349_v35 = vsub.f32 %v3019_v45, %v1409_v55  ;;  %v3352_v33 = vsub.f32 %v3022_v46, %v1413_v59 }
 0x1af   : > { %3742 = vst [vmem:[#allocation5_spill] sm:$0xff] %v3343_v15  ;;  %v1782_v54 = vrot.slane %v1774_v52, %v2849_v12  ;;  %v3356_v41 = vsub.f32 %v3031_v57, %v1417_v25  ;;  %v3359_v30 = vsub.f32 %v3088_v0, %v1421_v29  ;;  %v1570_v47 = vmul.f32 %v3337_v42, %v3337_v42 }
 0x1b0   : > { %3743 = vst [vmem:[#allocation6_spill] sm:$0xff] %v3346_v21  ;;  %3744 = vst [vmem:[#allocation7_spill] sm:$0xff] %v3349_v35  ;;  %v1789_v48 = vrot.slane %v1775_v17, %v2849_v12  ;;  %v1571_v45 = vmul.f32 %v3340_v7, %v3340_v7  ;;  %v1572_v46 = vmul.f32 %v3343_v15, %v3343_v15 }
 0x1b1   : > { %3745 = vst [vmem:[#allocation8_spill] sm:$0xff] %v3352_v33  ;;  %3746 = vst [vmem:[#allocation9_spill] sm:$0xff] %v3356_v41  ;;  %v1573_v26 = vmul.f32 %v3346_v21, %v3346_v21  ;;  %v1574_v57 = vmul.f32 %v3349_v35, %v3349_v35  ;;  %v1575_v0 = vmul.f32 %v3352_v33, %v3352_v33  ;;  %v3758_v33 = vld [vmem:[#allocation4_spill] sm:$0xff] }
 0x1b2   : > { %3747 = vst [vmem:[#allocation10_spill] sm:$0xff] %v3359_v30  ;;  %v1576_v36 = vmul.f32 %v3356_v41, %v3356_v41  ;;  %v1577_v58 = vmul.f32 %v3359_v30, %v3359_v30  ;;  %v1790_v60 = vcombine.low %v1782_v54, %v1789_v48  ;;  %v1679_v11 = vcombine.low %v1570_v47, %v1571_v45  ;;  %v3757_v30 = vld [vmem:[#allocation3_spill] sm:$0xff] }
 0x1b3   : > { %v1680_v63 = vcombine.low %v1572_v46, %v1573_v26  ;;  %v1595_v14 = vmul.f32 %v3279_v62, %v3279_v62  ;;  %v1681_v27 = vcombine.low %v1574_v57, %v1575_v0  ;;  %v1461_v55 = vrot.slane %v3314_v32, %v3173_v37 }
 0x1b4   : > { %v1682_v22 = vcombine.low %v1576_v36, %v1577_v58  ;;  %v1465_v9 = vrot.slane %v3314_v32, %v3176_v1  ;;  %v1869_v59 = vsel %vm1325_vm3, %v1790_v60, 0.0  ;;  %v1689_v25 = vrot.slane %v1679_v11, %v2849_v12 }
 0x1b5   : > { %v1696_v29 = vrot.slane %v1680_v63, %v2849_v12  ;;  %v1846_v52 = vrot.slane %v1595_v14, %v2849_v12  ;;  %1870 = vadd.xlane.f32.xlu1 %v1869_v59  ;;  %v1703_v17 = vrot.slane %v1681_v27, %v2849_v12  ;;  %v1469_v47 = vrot.slane %v3314_v32, %v3179_v31 }
 0x1b6   : > { %v1710_v54 = vrot.slane %v1682_v22, %v2849_v12  ;;  %v1473_v48 = vrot.slane %v3314_v32, %v3182_v51  ;;  %v1477_v26 = vrot.slane %v3314_v32, %v3185_v5  ;;  %v1481_v57 = vrot.slane %v3314_v32, %v3188_v4 }
 0x1b7   : > { %v1711_v45 = vcombine.low %v1689_v25, %v1696_v29  ;;  %v1853_v46 = vrot.slane %v1846_v52, %v2849_v12  ;;  %v1485_v36 = vrot.slane %v3314_v32, %v3191_v34  ;;  %v1489_v58 = vrot.slane %v3314_v32, %v3194_v50 }
 0x1b8   : > { %v1712_v0 = vcombine.low %v1703_v17, %v1710_v54  ;;  %v3404_v60 = vsub.f32 %v3079_v3, %v1461_v55  ;;  %v3409_v14 = vsub.f32 %v3082_v44, %v1465_v9  ;;  %v3412_v27 = vsub.f32 %v3091_v16, %v1469_v47 }
 0x1b9   : > { %v1719_v11 = vrot.slane %v1711_v45, %v2849_v12  ;;  %v1875_v63 = vsel %vm1332_vm4, %v1853_v46, 0.0  ;;  %v3416_v59 = vsub.f32 %v3085_v43, %v1473_v48  ;;  %v3419_v32 = vsub.f32 %v3094_v18, %v1477_v26 }
 0x1ba   : > { %3748 = vst [vmem:[#allocation11_spill] sm:$0xff] %v3404_v60  ;;  %3749 = vst [vmem:[#allocation12_spill] sm:$0xff] %v3409_v14  ;;  %v1726_v22 = vrot.slane %v1712_v0, %v2849_v12  ;;  %1876 = vadd.xlane.f32.xlu1 %v1875_v63  ;;  %v3422_v3 = vsub.f32 %v3099_v39, %v1481_v57  ;;  %v3425_v55 = vsub.f32 %v3110_v53, %v1485_v36 }
 0x1bb   : > { %3750 = vst [vmem:[#allocation13_spill] sm:$0xff] %v3412_v27  ;;  %3751 = vst [vmem:[#allocation14_spill] sm:$0xff] %v3416_v59  ;;  %v3428_v44 = vsub.f32 %v3113_v23, %v1489_v58  ;;  %v1587_v16 = vmul.f32 %v3404_v60, %v3404_v60  ;;  %v1588_v9 = vmul.f32 %v3409_v14, %v3409_v14  ;;  %v3756_v14 = vld [vmem:[#allocation2_spill] sm:$0xff] }
 0x1bc   : > { %3752 = vst [vmem:[#allocation15_spill] sm:$0xff] %v3419_v32  ;;  %3753 = vst [vmem:[#allocation16_spill] sm:$0xff] %v3422_v3  ;;  %v1727_v43 = vcombine.low %v1719_v11, %v1726_v22  ;;  %v1589_v18 = vmul.f32 %v3412_v27, %v3412_v27  ;;  %v1590_v39 = vmul.f32 %v3416_v59, %v3416_v59 }
 0x1bd   : > { %3754 = vst [vmem:[#allocation17_spill] sm:$0xff] %v3425_v55  ;;  %3755 = vst [vmem:[#allocation18_spill] sm:$0xff] %v3428_v44  ;;  %v1591_v53 = vmul.f32 %v3419_v32, %v3419_v32  ;;  %v1592_v23 = vmul.f32 %v3422_v3, %v3422_v3  ;;  %v1593_v25 = vmul.f32 %v3425_v55, %v3425_v55 }
 0x1be   : > { %v1594_v29 = vmul.f32 %v3428_v44, %v3428_v44  ;;  %v1791_v52 = vcombine.low %v1587_v16, %v1588_v9  ;;  %v1863_v17 = vsel %vm1325_vm3, %v1727_v43, 0.0  ;;  %v1792_v54 = vcombine.low %v1589_v18, %v1590_v39  ;;  %v2694_v16 = vld [vmem:[%s3719_s3] ss:$0 sm:$0xff] }
 0x1bf   : > { %1864 = vadd.xlane.f32.xlu0 %v1863_v17  ;;  %v1793_v47 = vcombine.low %v1591_v53, %v1592_v23  ;;  %v2695_v9 = vld [vmem:[%s3720_s4] ss:$0 sm:$0xff]  ;;  %v2111_v53 = vcombine.high %v2694_v16, %v2694_v16 }
 0x1c0   : > { %v1794_v48 = vcombine.low %v1593_v25, %v1594_v29  ;;  %v1801_v45 = vrot.slane %v1791_v52, %v2849_v12  ;;  %v1808_v46 = vrot.slane %v1792_v54, %v2849_v12  ;;  %v2207_v23 = vcombine.high %v2695_v9, %v2695_v9 }
 0x1c1   : > { %v1815_v26 = vrot.slane %v1793_v47, %v2849_v12  ;;  %v2118_v52 = vrot.slane %v2694_v16, %v2849_v12  ;;  %v2125_v17 = vrot.slane %v2111_v53, %v2849_v12  ;;  %v2214_v54 = vrot.slane %v2695_v9, %v2849_v12 }
 0x1c2   : > { %v1822_v57 = vrot.slane %v1794_v48, %v2849_v12  ;;  %v1823_v0 = vcombine.low %v1801_v45, %v1808_v46  ;;  %v2221_v47 = vrot.slane %v2207_v23, %v2849_v12 }
 0x1c3   : > { %v2126_v45 = vcombine.high %v2118_v52, %v2118_v52  ;;  %v2127_v46 = vcombine.high %v2125_v17, %v2125_v17 }
 0x1c4   : > { %v1824_v36 = vcombine.low %v1815_v26, %v1822_v57  ;;  %v1831_v58 = vrot.slane %v1823_v0, %v2849_v12  ;;  %v2222_v26 = vcombine.high %v2214_v54, %v2214_v54  ;;  %v2223_v57 = vcombine.high %v2221_v47, %v2221_v47 }
 0x1c5   : > { %v3465_v0 = vrot.slane %v2118_v52, %v2849_v12  ;;  %v3480_v9 = vrot.slane %v2221_v47, %v2849_v12 }
 0x1c6   : > { %v1838_v11 = vrot.slane %v1824_v36, %v2849_v12  ;;  %v3468_v36 = vrot.slane %v2125_v17, %v2849_v12 }
 0x1c7   : > { %v3490_v53 = vcombine.high %v3465_v0, %v3465_v0  ;;  %v3510_v47 = vcombine.high %v3480_v9, %v3480_v9 }
 0x1c8   : > { %v1839_v63 = vcombine.low %v1831_v58, %v1838_v11  ;;  %v3471_v11 = vrot.slane %v2126_v45, %v2849_v12  ;;  %v3494_v23 = vcombine.high %v3468_v36, %v3468_v36 }
 0x1ca   : > { %v1872_v22 = vsel %vm1325_vm3, %v1839_v63, 0.0  ;;  %v3474_v63 = vrot.slane %v2127_v46, %v2849_v12 }
 0x1cb   : > { %1873 = vadd.xlane.f32.xlu0 %v1872_v22  ;;  %v3477_v22 = vrot.slane %v2214_v54, %v2849_v12 }
 0x1cc   : > { %v3502_v52 = vcombine.high %v3474_v63, %v3474_v63 }
 0x1cd   : > { %v3506_v17 = vcombine.high %v3477_v22, %v3477_v22 }
 0x232   : > { %v1862_v43 = vpop.xlane.xlu1 %1861  ;;  %v1868_v18 = vpop.xlane.xlu0 %1867 }
 0x233   : > { %v1878_v39 = vmul.f32 0.03125, %v1862_v43  ;;  %v1880_v29 = vmul.f32 0.03125, %v1868_v18  ;;  %v3483_v43 = vrot.slane %v2222_v26, %v2849_v12  ;;  %v3486_v18 = vrot.slane %v2223_v57, %v2849_v12 }
 0x235   : > { %v1884_v25 = vadd.f32 1e-05, %v1878_v39  ;;  %v1886_v48 = vadd.f32 1e-05, %v1880_v29  ;;  %v3498_v29 = vcombine.high %v3471_v11, %v3471_v11  ;;  %v3518_v45 = vcombine.high %v3486_v18, %v3486_v18 }
 0x237   : > { %2764 = vrsqrt.f32 %v1884_v25 }
 0x238   : > { %2766 = vrsqrt.f32 %v1886_v48  ;;  %v3514_v48 = vcombine.high %v3483_v43, %v3483_v43 }
 0x23e   : > { %v1871_v58 = vpop.xlane.xlu1 %1870 }
 0x23f   : > { %v1881_v16 = vmul.f32 0.03125, %v1871_v58 }
 0x241   : > { %v1887_v39 = vadd.f32 1e-05, %v1881_v16 }
 0x243   : > { %v1877_v25 = vpop.xlane.xlu1 %1876  ;;  %2768 = vrsqrt.f32 %v1887_v39 }
 0x244   : > { %v2765_v54 = vpop.eup %2764  ;;  %v1883_v46 = vmul.f32 0.03125, %v1877_v25 }
 0x245   : > { %v1905_v26 = vrot.slane %v2765_v54, %v3173_v37  ;;  %v1909_v57 = vrot.slane %v2765_v54, %v3176_v1  ;;  %v1913_v58 = vrot.slane %v2765_v54, %v3179_v31  ;;  %v1917_v16 = vrot.slane %v2765_v54, %v3182_v51 }
 0x246   : > { %v1921_v39 = vrot.slane %v2765_v54, %v3185_v5  ;;  %v1925_v44 = vrot.slane %v2765_v54, %v3188_v4  ;;  %v1929_v55 = vrot.slane %v2765_v54, %v3191_v34  ;;  %v1933_v3 = vrot.slane %v2765_v54, %v3194_v50 }
 0x247   : > { %v2072_v32 = vmul.f32 %v1905_v26, %v3205_v8  ;;  %v2073_v25 = vmul.f32 %v1909_v57, %v3208_v2  ;;  %v2074_v59 = vmul.f32 %v1913_v58, %v3211_v40  ;;  %v2075_v27 = vmul.f32 %v1917_v16, %v3214_v19  ;;  %v2767_v26 = vpop.eup %2766 }
 0x248   : > { %v2076_v60 = vmul.f32 %v1921_v39, %v3756_v14  ;;  %v2077_v41 = vmul.f32 %v1925_v44, %v3757_v30  ;;  %v2078_v35 = vmul.f32 %v1929_v55, %v3758_v33  ;;  %v2079_v21 = vmul.f32 %v1933_v3, %v3226_v6  ;;  %v1865_v33 = vpop.xlane.xlu0 %1864 }
 0x249   : > { %v2168_v15 = vmul.f32 %v3465_v0, %v2072_v32  ;;  %v2169_v54 = vmul.f32 %v3471_v11, %v2073_v25  ;;  %v2170_v8 = vmul.f32 %v3490_v53, %v2074_v59  ;;  %v2171_v2 = vmul.f32 %v3498_v29, %v2075_v27 }
 0x24a   : > { %v2172_v40 = vmul.f32 %v3468_v36, %v2076_v60  ;;  %v2173_v19 = vmul.f32 %v3474_v63, %v2077_v41  ;;  %v2174_v14 = vmul.f32 %v3494_v23, %v2078_v35  ;;  %v2175_v30 = vmul.f32 %v3502_v52, %v2079_v21 }
 0x24b   : > { %v2264_v6 = vadd.f32 %v3477_v22, %v2168_v15  ;;  %v2265_v32 = vadd.f32 %v3483_v43, %v2169_v54  ;;  %v2266_v3 = vadd.f32 %v3506_v17, %v2170_v8  ;;  %v2267_v59 = vadd.f32 %v3514_v48, %v2171_v2 }
 0x24c   : > { %v2268_v27 = vadd.f32 %v3480_v9, %v2172_v40  ;;  %v2269_v55 = vadd.f32 %v3486_v18, %v2173_v19  ;;  %v2270_v60 = vadd.f32 %v3510_v47, %v2174_v14  ;;  %v2271_v41 = vadd.f32 %v3518_v45, %v2175_v30 }
 0x24d   : > { %v2332_v35 = vcombine.low %v2264_v6, %v2265_v32  ;;  %v2333_v44 = vcombine.low %v2266_v3, %v2267_v59  ;;  %v1969_v21 = vrot.slane %v2767_v26, %v3173_v37  ;;  %v1879_v57 = vmul.f32 0.03125, %v1865_v33 }
 0x24e   : > { %v2334_v15 = vcombine.low %v2268_v27, %v2269_v55  ;;  %v2335_v58 = vcombine.low %v2270_v60, %v2271_v41  ;;  %v1889_v16 = vadd.f32 1e-05, %v1883_v46 }
 0x24f   : > { %v2342_v39 = vrot.slane %v2332_v35, %v2849_v12  ;;  %v2349_v25 = vrot.slane %v2333_v44, %v2849_v12  ;;  %v2088_v54 = vmul.f32 %v1969_v21, %v3255_v13  ;;  %v1885_v19 = vadd.f32 1e-05, %v1879_v57 }
 0x250   : > { %v2769_v8 = vpop.eup %2768  ;;  %v2356_v2 = vrot.slane %v2334_v15, %v2849_v12  ;;  %v2363_v40 = vrot.slane %v2335_v58, %v2849_v12  ;;  %2770 = vrsqrt.f32 %v1889_v16 }
 0x251   : > { %v2364_v26 = vcombine.low %v2342_v39, %v2349_v25  ;;  %v2184_v14 = vmul.f32 %v3465_v0, %v2088_v54  ;;  %v1973_v46 = vrot.slane %v2769_v8, %v3173_v37  ;;  %v1977_v30 = vrot.slane %v2769_v8, %v3176_v1 }
 0x252   : > { %v2365_v33 = vcombine.low %v2356_v2, %v2363_v40  ;;  %v1981_v6 = vrot.slane %v2769_v8, %v3179_v31  ;;  %v1985_v13 = vrot.slane %v2769_v8, %v3182_v51  ;;  %v1989_v32 = vrot.slane %v2769_v8, %v3185_v5 }
 0x253   : > { %v2372_v3 = vrot.slane %v2364_v26, %v2849_v12  ;;  %v2280_v59 = vadd.f32 %v3477_v22, %v2184_v14  ;;  %v1993_v27 = vrot.slane %v2769_v8, %v3188_v4  ;;  %v1997_v55 = vrot.slane %v2769_v8, %v3191_v34 }
 0x254   : > { %v2379_v60 = vrot.slane %v2365_v33, %v2849_v12  ;;  %v2001_v41 = vrot.slane %v2769_v8, %v3194_v50  ;;  %v2089_v35 = vmul.f32 %v1973_v46, %v3266_v20  ;;  %v2090_v44 = vmul.f32 %v1977_v30, %v3270_v61  ;;  %v1874_v30 = vpop.xlane.xlu0 %1873 }
 0x255   : > { %v2436_v21 = vrot.slane %v2280_v59, %v2849_v12  ;;  %v2091_v57 = vmul.f32 %v1981_v6, %v3273_v49  ;;  %v2092_v15 = vmul.f32 %v1985_v13, %v3276_v10  ;;  %v2093_v58 = vmul.f32 %v1989_v32, %v3284_v24 }
 0x256   : > { %v2380_v16 = vcombine.low %v2372_v3, %v2379_v60  ;;  %v2094_v20 = vmul.f32 %v1993_v27, %v3287_v38  ;;  %v2095_v61 = vmul.f32 %v1997_v55, %v3290_v28  ;;  %v2096_v39 = vmul.f32 %v2001_v41, %v3293_v56  ;;  %v2594_v38 = vld [vmem:[%s3577_s21 + $0x8] sm:$0x1] }
 0x257   : > { %v2443_v25 = vrot.slane %v2436_v21, %v2849_v12  ;;  %v2185_v54 = vmul.f32 %v3465_v0, %v2089_v35  ;;  %v2186_v8 = vmul.f32 %v3471_v11, %v2090_v44  ;;  %v2187_v49 = vmul.f32 %v3490_v53, %v2091_v57 }
 0x258   : > { %v2704_v24 = vpack.c.bf16 %v2380_v16, %v2380_v16  ;;  %v2188_v28 = vmul.f32 %v3498_v29, %v2092_v15  ;;  %v2189_v56 = vmul.f32 %v3468_v36, %v2093_v58  ;;  %v2190_v2 = vmul.f32 %v3474_v63, %v2094_v20 }
 0x259   : > { %v2706_v40 = vpack.c.bf16 %v2443_v25, %v2443_v25  ;;  %v2191_v26 = vmul.f32 %v3494_v23, %v2095_v61  ;;  %v2192_v14 = vmul.f32 %v3502_v52, %v2096_v39  ;;  %v2281_v46 = vadd.f32 %v3477_v22, %v2185_v54 }
 0x25a   : > { %2589 = vst.msk [vmem:[%s3577_s21] sm:$0xf] %vm2588_vm6, %v2704_v24  ;;  %v2282_v33 = vadd.f32 %v3483_v43, %v2186_v8  ;;  %v2283_v6 = vadd.f32 %v3506_v17, %v2187_v49  ;;  %v2284_v13 = vadd.f32 %v3514_v48, %v2188_v28  ;;  %v2285_v32 = vadd.f32 %v3480_v9, %v2189_v56 }
 0x25b   : > { %v2595_v3 = vsel %vm3592_vm7, %v2706_v40, %v2594_v38  ;;  %v2286_v59 = vadd.f32 %v3486_v18, %v2190_v2  ;;  %v2287_v27 = vadd.f32 %v3510_v47, %v2191_v26  ;;  %v2288_v55 = vadd.f32 %v3518_v45, %v2192_v14 }
 0x25c   : > { %2596 = vst [vmem:[%s3577_s21 + $0x8] sm:$0x1] %v2595_v3  ;;  %v2444_v60 = vcombine.low %v2281_v46, %v2282_v33  ;;  %v2445_v41 = vcombine.low %v2283_v6, %v2284_v13  ;;  %2772 = vrsqrt.f32 %v1885_v19  ;;  %v1882_v35 = vmul.f32 0.03125, %v1874_v30 }
 0x25d   : > { %v2771_v44 = vpop.eup %2770  ;;  %v2446_v21 = vcombine.low %v2285_v32, %v2286_v59  ;;  %v2447_v57 = vcombine.low %v2287_v27, %v2288_v55  ;;  %v3761_v27 = vld [vmem:[#allocation5_spill] sm:$0xff] }
 0x25e   : > { %v2454_v15 = vrot.slane %v2444_v60, %v2849_v12  ;;  %v2461_v58 = vrot.slane %v2445_v41, %v2849_v12  ;;  %v2037_v16 = vrot.slane %v2771_v44, %v3173_v37  ;;  %v1888_v20 = vadd.f32 1e-05, %v1882_v35  ;;  %v3762_v60 = vld [vmem:[#allocation6_spill] sm:$0xff]  ;;  %v3763_v35 = vld [vmem:[#allocation7_spill] sm:$0xff] }
 0x25f   : > { %v2468_v61 = vrot.slane %v2446_v21, %v2849_v12  ;;  %v2475_v39 = vrot.slane %v2447_v57, %v2849_v12  ;;  %v3764_v21 = vld [vmem:[#allocation8_spill] sm:$0xff] }
 0x260   : > { %v2476_v25 = vcombine.low %v2454_v15, %v2461_v58  ;;  %v2105_v54 = vmul.f32 %v2037_v16, %v3279_v62  ;;  %2774 = vrsqrt.f32 %v1888_v20  ;;  %v3765_v15 = vld [vmem:[#allocation9_spill] sm:$0xff]  ;;  %v3766_v16 = vld [vmem:[#allocation10_spill] sm:$0xff] }
 0x261   : > { %v2477_v19 = vcombine.low %v2468_v61, %v2475_v39 }
 0x262   : > { %v2484_v8 = vrot.slane %v2476_v25, %v2849_v12  ;;  %v2201_v49 = vmul.f32 %v3465_v0, %v2105_v54 }
 0x263   : > { %v2491_v24 = vrot.slane %v2477_v19, %v2849_v12 }
 0x264   : > { %v2297_v38 = vadd.f32 %v3477_v22, %v2201_v49 }
 0x265   : > { %v2492_v28 = vcombine.low %v2484_v8, %v2491_v24 }
 0x266   : > { %v2548_v56 = vrot.slane %v2297_v38, %v2849_v12 }
 0x267   : > { %v2707_v2 = vpack.c.bf16 %v2492_v28, %v2492_v28 }
 0x268   : > { %v2555_v26 = vrot.slane %v2548_v56, %v2849_v12 }
 0x269   : > { %v2773_v40 = vpop.eup %2772  ;;  %2597 = vst.msk [vmem:[%s3577_s21 + $0xc] sm:$0xf] %vm2588_vm6, %v2707_v2 }
 0x26a   : > { %v1937_v62 = vrot.slane %v2773_v40, %v3173_v37  ;;  %v1941_v14 = vrot.slane %v2773_v40, %v3176_v1  ;;  %v1945_v46 = vrot.slane %v2773_v40, %v3179_v31  ;;  %v1949_v30 = vrot.slane %v2773_v40, %v3182_v51 }
 0x26b   : > { %v1953_v33 = vrot.slane %v2773_v40, %v3185_v5  ;;  %v1957_v6 = vrot.slane %v2773_v40, %v3188_v4  ;;  %v1961_v13 = vrot.slane %v2773_v40, %v3191_v34  ;;  %v1965_v32 = vrot.slane %v2773_v40, %v3194_v50 }
 0x26c   : > { %v2080_v3 = vmul.f32 %v1937_v62, %v3337_v42  ;;  %v2081_v59 = vmul.f32 %v1941_v14, %v3340_v7  ;;  %v2082_v55 = vmul.f32 %v1945_v46, %v3761_v27  ;;  %v2083_v41 = vmul.f32 %v1949_v30, %v3762_v60  ;;  %v2599_v46 = vld [vmem:[%s3577_s21 + $0x14] sm:$0x1] }
 0x26d   : > { %v2084_v44 = vmul.f32 %v1953_v33, %v3763_v35  ;;  %v2085_v57 = vmul.f32 %v1957_v6, %v3764_v21  ;;  %v2086_v58 = vmul.f32 %v1961_v13, %v3765_v15  ;;  %v2087_v20 = vmul.f32 %v1965_v32, %v3766_v16  ;;  %v2775_v25 = vpop.eup %2774  ;;  %v3767_v15 = vld [vmem:[#allocation11_spill] sm:$0xff]  ;;  %v3768_v16 = vld [vmem:[#allocation12_spill] sm:$0xff] }
 0x26e   : > { %v2176_v61 = vmul.f32 %v3465_v0, %v2080_v3  ;;  %v2177_v39 = vmul.f32 %v3471_v11, %v2081_v59  ;;  %v2178_v42 = vmul.f32 %v3490_v53, %v2082_v55  ;;  %v2179_v7 = vmul.f32 %v3498_v29, %v2083_v41 }
 0x26f   : > { %v2180_v54 = vmul.f32 %v3468_v36, %v2084_v44  ;;  %v2181_v19 = vmul.f32 %v3474_v63, %v2085_v57  ;;  %v2182_v8 = vmul.f32 %v3494_v23, %v2086_v58  ;;  %v2183_v49 = vmul.f32 %v3502_v52, %v2087_v20 }
 0x270   : > { %v2272_v24 = vadd.f32 %v3477_v22, %v2176_v61  ;;  %v2273_v38 = vadd.f32 %v3483_v43, %v2177_v39  ;;  %v2274_v28 = vadd.f32 %v3506_v17, %v2178_v42  ;;  %v2275_v56 = vadd.f32 %v3514_v48, %v2179_v7  ;;  %v3770_v39 = vld [vmem:[#allocation14_spill] sm:$0xff] }
 0x271   : > { %v2276_v2 = vadd.f32 %v3480_v9, %v2180_v54  ;;  %v2277_v40 = vadd.f32 %v3486_v18, %v2181_v19  ;;  %v2278_v62 = vadd.f32 %v3510_v47, %v2182_v8  ;;  %v2279_v14 = vadd.f32 %v3518_v45, %v2183_v49  ;;  %v3771_v54 = vld [vmem:[#allocation15_spill] sm:$0xff]  ;;  %v3772_v19 = vld [vmem:[#allocation16_spill] sm:$0xff]  ;;  %v3773_v8 = vld [vmem:[#allocation17_spill] sm:$0xff] }
 0x272   : > { %v2381_v30 = vcombine.low %v2272_v24, %v2273_v38  ;;  %v2382_v33 = vcombine.low %v2274_v28, %v2275_v56  ;;  %v2709_v6 = vpack.c.bf16 %v2555_v26, %v2555_v26  ;;  %v2005_v13 = vrot.slane %v2775_v25, %v3173_v37 }
 0x273   : > { %v2383_v32 = vcombine.low %v2276_v2, %v2277_v40  ;;  %v2384_v3 = vcombine.low %v2278_v62, %v2279_v14  ;;  %v2009_v59 = vrot.slane %v2775_v25, %v3176_v1  ;;  %v2013_v27 = vrot.slane %v2775_v25, %v3179_v31 }
 0x274   : > { %v2391_v55 = vrot.slane %v2381_v30, %v2849_v12  ;;  %v2398_v60 = vrot.slane %v2382_v33, %v2849_v12  ;;  %v2600_v41 = vsel %vm3592_vm7, %v2709_v6, %v2599_v46  ;;  %v2017_v35 = vrot.slane %v2775_v25, %v3182_v51  ;;  %v3769_v51 = vld [vmem:[#allocation13_spill] sm:$0xff] }
 0x275   : > { %v2405_v44 = vrot.slane %v2383_v32, %v2849_v12  ;;  %v2412_v26 = vrot.slane %v2384_v3, %v2849_v12  ;;  %2601 = vst [vmem:[%s3577_s21 + $0x14] sm:$0x1] %v2600_v41  ;;  %v2021_v37 = vrot.slane %v2775_v25, %v3185_v5  ;;  %v2025_v1 = vrot.slane %v2775_v25, %v3188_v4 }
 0x276   : > { %v2413_v21 = vcombine.low %v2391_v55, %v2398_v60  ;;  %v2029_v31 = vrot.slane %v2775_v25, %v3191_v34  ;;  %v2033_v57 = vrot.slane %v2775_v25, %v3194_v50  ;;  %v2097_v58 = vmul.f32 %v2005_v13, %v3767_v15  ;;  %v3774_v50 = vld [vmem:[#allocation18_spill] sm:$0xff] }
 0x277   : > { %v2414_v10 = vcombine.low %v2405_v44, %v2412_v26  ;;  %v2098_v20 = vmul.f32 %v2009_v59, %v3768_v16  ;;  %v2099_v61 = vmul.f32 %v2013_v27, %v3769_v51  ;;  %v2100_v42 = vmul.f32 %v2017_v35, %v3770_v39 }
 0x278   : > { %v2421_v7 = vrot.slane %v2413_v21, %v2849_v12  ;;  %v2101_v5 = vmul.f32 %v2021_v37, %v3771_v54  ;;  %v2102_v4 = vmul.f32 %v2025_v1, %v3772_v19  ;;  %v2103_v49 = vmul.f32 %v2029_v31, %v3773_v8 }
 0x279   : > { %v2428_v34 = vrot.slane %v2414_v10, %v2849_v12  ;;  %v2104_v25 = vmul.f32 %v2033_v57, %v3774_v50  ;;  %v2193_v24 = vmul.f32 %v3465_v0, %v2097_v58  ;;  %v2194_v38 = vmul.f32 %v3471_v11, %v2098_v20 }
 0x27a   : > { %v2195_v28 = vmul.f32 %v3490_v53, %v2099_v61  ;;  %v2196_v56 = vmul.f32 %v3498_v29, %v2100_v42  ;;  %v2197_v2 = vmul.f32 %v3468_v36, %v2101_v5  ;;  %v2198_v40 = vmul.f32 %v3474_v63, %v2102_v4 }
 0x27b   : > { %v2429_v62 = vcombine.low %v2421_v7, %v2428_v34  ;;  %v2199_v14 = vmul.f32 %v3494_v23, %v2103_v49  ;;  %v2200_v46 = vmul.f32 %v3502_v52, %v2104_v25  ;;  %v2289_v30 = vadd.f32 %v3477_v22, %v2193_v24 }
 0x27c   : > { %v2290_v0 = vadd.f32 %v3483_v43, %v2194_v38  ;;  %v2291_v11 = vadd.f32 %v3506_v17, %v2195_v28  ;;  %v2292_v53 = vadd.f32 %v3514_v48, %v2196_v56  ;;  %v2293_v29 = vadd.f32 %v3480_v9, %v2197_v2 }
 0x27d   : > { %v2705_v33 = vpack.c.bf16 %v2429_v62, %v2429_v62  ;;  %v2294_v36 = vadd.f32 %v3486_v18, %v2198_v40  ;;  %v2295_v63 = vadd.f32 %v3510_v47, %v2199_v14  ;;  %v2296_v6 = vadd.f32 %v3518_v45, %v2200_v46 }
 0x27e   : > { %v2493_v23 = vcombine.low %v2289_v30, %v2290_v0  ;;  %v2494_v52 = vcombine.low %v2291_v11, %v2292_v53 }
 0x27f   : > { %2590 = vst.msk [vmem:[%s3577_s21 + $0x4] sm:$0xf] %vm2588_vm6, %v2705_v33  ;;  %v2495_v22 = vcombine.low %v2293_v29, %v2294_v36  ;;  %v2496_v43 = vcombine.low %v2295_v63, %v2296_v6 }
 0x280   : > { %v2503_v17 = vrot.slane %v2493_v23, %v2849_v12  ;;  %v2510_v48 = vrot.slane %v2494_v52, %v2849_v12 }
 0x281   : > { %v2517_v9 = vrot.slane %v2495_v22, %v2849_v12  ;;  %v2524_v13 = vrot.slane %v2496_v43, %v2849_v12 }
 0x282   : > { %v2525_v18 = vcombine.low %v2503_v17, %v2510_v48 }
 0x283   : > { %v2526_v32 = vcombine.low %v2517_v9, %v2524_v13 }
 0x284   : > { %v2533_v47 = vrot.slane %v2525_v18, %v2849_v12 }
 0x285   : > { %v2540_v45 = vrot.slane %v2526_v32, %v2849_v12 }
 0x287   : > { %v2541_v3 = vcombine.low %v2533_v47, %v2540_v45 }
 0x289   : > { %v2708_v59 = vpack.c.bf16 %v2541_v3, %v2541_v3 }
 0x28b   : > { %2598 = vst.msk [vmem:[%s3577_s21 + $0x10] sm:$0xf] %vm2588_vm6, %v2708_v59 }
 0x28c PF: > { %s15_s18 = sadd.s32 1, %s2782_s18  }
 0x28d   : > { %p12_p4 = scmp.ge.s32.totalorder %s15_s18, 4  }
 0x28f   :  { %14 = sbr.rel (!%p12_p4) target bundleno = 1 (0x1), region = 70 }

</bundles_post_ra>
